<compile_context>
chip_gen: v6e
topology: v6e:2x2x1
jax: 0.10.0
libtpu: 0.0.40
codegen_flags: <defaults>
</compile_context>

<pallas_src>
import jax
import jax.numpy as jnp
from jax.experimental import pallas as pl
from jax.experimental.pallas import tpu as pltpu


def _make_net_kernel(n_hidden, d_in):
    """Fourier features -> MLP (tanh) -> linear out, batch in lanes.

    refs layout (positional):
      x_ref              (d_in, TN)
      bt_ref             (n_feat, d_in)          == B.T
      w0a_ref, w0b_ref   (size, n_feat) each     == first weight split at n_feat
      b0_ref             (size, 1)
      [W_i, b_i] * n_hidden   (size, size), (size, 1)
      wl_ref, bl_ref     (n_out, size), (n_out, 1)
      o_ref              (n_out, TN)
    """

    def kernel(*refs):
        x_ref, bt_ref, w0a_ref, w0b_ref, b0_ref = refs[:5]
        o_ref = refs[-1]
        wb_refs = refs[5:-1]

        x = x_ref[...]                         # (d_in, TN) f32 (already f32, no casts)
        Bt = bt_ref[...]                       # (n_feat, d_in) f32

        # z = (x @ B)^T computed as VPU broadcast-FMAs: the contraction dim
        # d_in is tiny (2), so skip the MXU push/pop entirely for this step.
        z = Bt[:, 0:1] * x[0:1, :]
        for d in range(1, d_in):
            z = z + Bt[:, d:d + 1] * x[d:d + 1, :]          # (n_feat, TN)

        # First Linear with the cos/sin concat folded into split weights:
        #   h = W0[:, :n_feat] @ cos(z) + W0[:, n_feat:] @ sin(z) + b0
        # (no lane/sublane concatenation; live intermediate stays n_feat wide).
        h = jnp.dot(w0a_ref[...], jnp.cos(z), preferred_element_type=jnp.float32)
        h = h + jnp.dot(w0b_ref[...], jnp.sin(z), preferred_element_type=jnp.float32)
        h = jnp.tanh(h + b0_ref[...])

        # Hidden Linear + Tanh blocks (MXU matmul with TN-wide lane dimension).
        for i in range(n_hidden):
            W = wb_refs[2 * i][...]
            b = wb_refs[2 * i + 1][...]
            h = jnp.tanh(jnp.dot(W, h, preferred_element_type=jnp.float32) + b)

        # Output Linear (no activation); (n_out, TN) store is lane-dense.
        Wl = wb_refs[2 * n_hidden][...]
        bl = wb_refs[2 * n_hidden + 1][...]
        o_ref[...] = (jnp.dot(Wl, h, preferred_element_type=jnp.float32)
                      + bl).astype(o_ref.dtype)

    return kernel


def net_forward(x, B, weights, biases, *, tile_n=256):
    """Pallas forward pass of the DFFNN Net.

    x:        (N, d_in) float32
    B:        (d_in, n_feat) float32
    weights:  list of PyTorch-layout (out_i, in_i) float32 matrices
    biases:   list of (out_i,) float32 vectors
    returns:  (N, n_output) float32
    """
    N, d_in = x.shape
    n_feat = B.shape[1]
    n_output = weights[-1].shape[0]
    n_hidden = len(weights) - 2
    assert n_hidden >= 0
    assert tile_n % 128 == 0, "tile_n must be a multiple of the 128-lane width"

    # Pad the batch so it tiles evenly; padded lanes are computed and discarded.
    n_pad = -(-N // tile_n) * tile_n
    x_t = x.T                                        # (d_in, N): batch -> lanes
    if n_pad != N:
        x_t = jnp.pad(x_t, ((0, 0), (0, n_pad - N)))

    Bt = B.T                                         # (n_feat, d_in)
    W0a = weights[0][:, :n_feat]                     # (size, n_feat) for cos(z)
    W0b = weights[0][:, n_feat:]                     # (size, n_feat) for sin(z)
    b0 = biases[0].reshape(-1, 1)

    flat_params = [Bt, W0a, W0b, b0]
    for W, b in zip(weights[1:], biases[1:]):
        flat_params.append(W)                        # (out, in), used as W @ h
        flat_params.append(b.reshape(-1, 1))         # (out, 1), lane-broadcast

    kernel = _make_net_kernel(n_hidden, d_in)
    grid = (n_pad // tile_n,)

    x_spec = pl.BlockSpec((d_in, tile_n), lambda i: (0, i))
    out_spec = pl.BlockSpec((n_output, tile_n), lambda i: (0, i))
    out_shape = jax.ShapeDtypeStruct((n_output, n_pad), jnp.float32)

    def build(single_buffer_params):
        if single_buffer_params:
            # Parameter block indices never change across the grid: single
            # buffer them (no useless second VMEM buffer / DMA descriptors).
            def const(p):
                return pl.BlockSpec(p.shape, lambda i: (0, 0),
                                    pipeline_mode=pl.Buffered(1))
        else:
            def const(p):
                return pl.BlockSpec(p.shape, lambda i: (0, 0))
        in_specs = [x_spec] + [const(p) for p in flat_params]
        return pl.pallas_call(
            kernel,
            out_shape=out_shape,
            grid_spec=pltpu.PrefetchScalarGridSpec(
                num_scalar_prefetch=0,
                grid=grid,
                in_specs=in_specs,
                out_specs=out_spec,
            ),
            compiler_params=pltpu.CompilerParams(
                dimension_semantics=("parallel",),   # shard steps over v7x TCs
                vmem_limit_bytes=32 * 1024 * 1024,   # explicit; safe on v7x
            ),
        )

    try:
        out_t = build(single_buffer_params=True)(x_t, *flat_params)
    except Exception:  # fallback if this jax lacks pipeline_mode single-buffering
        out_t = build(single_buffer_params=False)(x_t, *flat_params)

    return out_t[:, :N].T                            # back to (N, n_output)


def init_params(key, d_in, n_feat, size, n_layers, n_output=2):
    """Deterministic params matching the PyTorch module (PyTorch layouts).

    Linear weights (out, in) with xavier_uniform, biases zero, B ~ N(0, 1).
    """
    keys = jax.random.split(key, n_layers + 3)
    B = jax.random.normal(keys[0], (d_in, n_feat), dtype=jnp.float32)

    n_input = 2 * n_feat
    dims = [n_input] + [size] * (n_layers + 1) + [n_output]
    weights, biases = [], []
    for li in range(len(dims) - 1):
        fan_in, fan_out = dims[li], dims[li + 1]
        bound = (6.0 / (fan_in + fan_out)) ** 0.5
        W = jax.random.uniform(keys[li + 1], (fan_out, fan_in),
                               minval=-bound, maxval=bound, dtype=jnp.float32)
        b = jnp.zeros((fan_out,), dtype=jnp.float32)
        weights.append(W)
        biases.append(b)
    return B, weights, biases


def reference_forward(x, B, weights, biases):
    """Pure-JAX reference mirroring the PyTorch forward (row-major layout)."""
    z = jnp.dot(x, B, precision="highest")
    h = jnp.concatenate([jnp.cos(z), jnp.sin(z)], axis=1)
    n = len(weights)
    for i, (W, b) in enumerate(zip(weights, biases)):
        h = jnp.dot(h, W.T, precision="highest") + b
        if i < n - 1:
            h = jnp.tanh(h)
    return h


if __name__ == "__main__":
    key = jax.random.PRNGKey(0)
    k_x, k_p = jax.random.split(key)

    # 2-D input coords, 16 Fourier frequencies -> n_input = 32, hidden = 32,
    # n_layers = 2, output = 2.  N = 2048 with tile_n = 256 gives 8 parallel
    # grid steps (256-wide MXU/lane tiles on v6e/v7x, both v7x TCs stay busy).
    N, d_in, n_feat, size, n_layers = 2048, 2, 16, 32, 2

    x = jax.random.normal(k_x, (N, d_in), dtype=jnp.float32)
    B, weights, biases = init_params(k_p, d_in, n_feat, size, n_layers)

    out = net_forward(x, B, weights, biases, tile_n=256)
    out = jax.block_until_ready(out)

    ref = reference_forward(x, B, weights, biases)
    assert out.shape == (N, 2)
    assert jnp.allclose(out, ref, atol=1e-5, rtol=1e-5), "mismatch vs reference"

    print("KERNEL_OK")
</pallas_src>

<mosaic_0001>
module attributes {stable_mosaic.version = 11 : i64} {
  func.func @kernel(%arg0: i32, %arg1: memref<2x256xf32, #tpu.memory_space<vmem>>, %arg2: memref<16x2xf32, #tpu.memory_space<vmem>>, %arg3: memref<32x16xf32, #tpu.memory_space<vmem>>, %arg4: memref<32x16xf32, #tpu.memory_space<vmem>>, %arg5: memref<32x1xf32, #tpu.memory_space<vmem>>, %arg6: memref<32x32xf32, #tpu.memory_space<vmem>>, %arg7: memref<32x1xf32, #tpu.memory_space<vmem>>, %arg8: memref<32x32xf32, #tpu.memory_space<vmem>>, %arg9: memref<32x1xf32, #tpu.memory_space<vmem>>, %arg10: memref<2x32xf32, #tpu.memory_space<vmem>>, %arg11: memref<2x1xf32, #tpu.memory_space<vmem>>, %arg12: memref<2x256xf32, #tpu.memory_space<vmem>>) attributes {dimension_semantics = [#tpu.dimension_semantics<parallel>], iteration_bounds = array<i64: 8>, scalar_prefetch = 0 : i64, scratch_operands = 0 : i64, tpu.core_type = #tpu.core_type<tc>, window_params = [{transform_indices = @transform_0, window_bounds = array<i64: 2, 256>}, {pipeline_mode = #tpu.pipeline_mode<synchronous>, transform_indices = @transform_1, window_bounds = array<i64: 16, 2>}, {pipeline_mode = #tpu.pipeline_mode<synchronous>, transform_indices = @transform_2, window_bounds = array<i64: 32, 16>}, {pipeline_mode = #tpu.pipeline_mode<synchronous>, transform_indices = @transform_3, window_bounds = array<i64: 32, 16>}, {pipeline_mode = #tpu.pipeline_mode<synchronous>, transform_indices = @transform_4, window_bounds = array<i64: 32, 1>}, {pipeline_mode = #tpu.pipeline_mode<synchronous>, transform_indices = @transform_5, window_bounds = array<i64: 32, 32>}, {pipeline_mode = #tpu.pipeline_mode<synchronous>, transform_indices = @transform_6, window_bounds = array<i64: 32, 1>}, {pipeline_mode = #tpu.pipeline_mode<synchronous>, transform_indices = @transform_7, window_bounds = array<i64: 32, 32>}, {pipeline_mode = #tpu.pipeline_mode<synchronous>, transform_indices = @transform_8, window_bounds = array<i64: 32, 1>}, {pipeline_mode = #tpu.pipeline_mode<synchronous>, transform_indices = @transform_9, window_bounds = array<i64: 2, 32>}, {pipeline_mode = #tpu.pipeline_mode<synchronous>, transform_indices = @transform_10, window_bounds = array<i64: 2, 1>}, {transform_indices = @transform_11, window_bounds = array<i64: 2, 256>}]} {
    %c0 = arith.constant 0 : index
    %c0_0 = arith.constant 0 : index
    %0 = vector.load %arg1[%c0, %c0_0] : memref<2x256xf32, #tpu.memory_space<vmem>>, vector<2x256xf32>
    %c0_1 = arith.constant 0 : index
    %c0_2 = arith.constant 0 : index
    %1 = vector.load %arg2[%c0_1, %c0_2] : memref<16x2xf32, #tpu.memory_space<vmem>>, vector<16x2xf32>
    %2 = vector.extract_strided_slice %1 {offsets = [0, 0], sizes = [16, 1], strides = [1, 1]} : vector<16x2xf32> to vector<16x1xf32>
    %3 = vector.extract_strided_slice %0 {offsets = [0, 0], sizes = [1, 256], strides = [1, 1]} : vector<2x256xf32> to vector<1x256xf32>
    %4 = vector.broadcast %2 : vector<16x1xf32> to vector<16x256xf32>
    %5 = vector.broadcast %3 : vector<1x256xf32> to vector<16x256xf32>
    %6 = arith.mulf %4, %5 : vector<16x256xf32>
    %7 = vector.extract_strided_slice %1 {offsets = [0, 1], sizes = [16, 1], strides = [1, 1]} : vector<16x2xf32> to vector<16x1xf32>
    %8 = vector.extract_strided_slice %0 {offsets = [1, 0], sizes = [1, 256], strides = [1, 1]} : vector<2x256xf32> to vector<1x256xf32>
    %9 = vector.broadcast %7 : vector<16x1xf32> to vector<16x256xf32>
    %10 = vector.broadcast %8 : vector<1x256xf32> to vector<16x256xf32>
    %11 = arith.mulf %9, %10 : vector<16x256xf32>
    %12 = arith.addf %6, %11 : vector<16x256xf32>
    %c0_3 = arith.constant 0 : index
    %c0_4 = arith.constant 0 : index
    %13 = vector.load %arg3[%c0_3, %c0_4] : memref<32x16xf32, #tpu.memory_space<vmem>>, vector<32x16xf32>
    %14 = math.cos %12 : vector<16x256xf32>
    %cst = arith.constant dense<0.000000e+00> : vector<32x256xf32>
    %15 = tpu.matmul %13, %14, %cst {dimension_numbers = #tpu.dot_dimension_numbers<[1], [0], [0], [1], [0, 0, 1, 1], [], []>} : vector<32x16xf32>, vector<16x256xf32>, vector<32x256xf32> -> vector<32x256xf32>
    %c0_5 = arith.constant 0 : index
    %c0_6 = arith.constant 0 : index
    %16 = vector.load %arg4[%c0_5, %c0_6] : memref<32x16xf32, #tpu.memory_space<vmem>>, vector<32x16xf32>
    %17 = math.sin %12 : vector<16x256xf32>
    %cst_7 = arith.constant dense<0.000000e+00> : vector<32x256xf32>
    %18 = tpu.matmul %16, %17, %cst_7 {dimension_numbers = #tpu.dot_dimension_numbers<[1], [0], [0], [1], [0, 0, 1, 1], [], []>} : vector<32x16xf32>, vector<16x256xf32>, vector<32x256xf32> -> vector<32x256xf32>
    %19 = arith.addf %15, %18 : vector<32x256xf32>
    %c0_8 = arith.constant 0 : index
    %c0_9 = arith.constant 0 : index
    %20 = vector.load %arg5[%c0_8, %c0_9] : memref<32x1xf32, #tpu.memory_space<vmem>>, vector<32x1xf32>
    %21 = vector.broadcast %20 : vector<32x1xf32> to vector<32x256xf32>
    %22 = arith.addf %19, %21 : vector<32x256xf32>
    %23 = math.tanh %22 : vector<32x256xf32>
    %c0_10 = arith.constant 0 : index
    %c0_11 = arith.constant 0 : index
    %24 = vector.load %arg6[%c0_10, %c0_11] : memref<32x32xf32, #tpu.memory_space<vmem>>, vector<32x32xf32>
    %c0_12 = arith.constant 0 : index
    %c0_13 = arith.constant 0 : index
    %25 = vector.load %arg7[%c0_12, %c0_13] : memref<32x1xf32, #tpu.memory_space<vmem>>, vector<32x1xf32>
    %cst_14 = arith.constant dense<0.000000e+00> : vector<32x256xf32>
    %26 = tpu.matmul %24, %23, %cst_14 {dimension_numbers = #tpu.dot_dimension_numbers<[1], [0], [0], [1], [0, 0, 1, 1], [], []>} : vector<32x32xf32>, vector<32x256xf32>, vector<32x256xf32> -> vector<32x256xf32>
    %27 = vector.broadcast %25 : vector<32x1xf32> to vector<32x256xf32>
    %28 = arith.addf %26, %27 : vector<32x256xf32>
    %29 = math.tanh %28 : vector<32x256xf32>
    %c0_15 = arith.constant 0 : index
    %c0_16 = arith.constant 0 : index
    %30 = vector.load %arg8[%c0_15, %c0_16] : memref<32x32xf32, #tpu.memory_space<vmem>>, vector<32x32xf32>
    %c0_17 = arith.constant 0 : index
    %c0_18 = arith.constant 0 : index
    %31 = vector.load %arg9[%c0_17, %c0_18] : memref<32x1xf32, #tpu.memory_space<vmem>>, vector<32x1xf32>
    %cst_19 = arith.constant dense<0.000000e+00> : vector<32x256xf32>
    %32 = tpu.matmul %30, %29, %cst_19 {dimension_numbers = #tpu.dot_dimension_numbers<[1], [0], [0], [1], [0, 0, 1, 1], [], []>} : vector<32x32xf32>, vector<32x256xf32>, vector<32x256xf32> -> vector<32x256xf32>
    %33 = vector.broadcast %31 : vector<32x1xf32> to vector<32x256xf32>
    %34 = arith.addf %32, %33 : vector<32x256xf32>
    %35 = math.tanh %34 : vector<32x256xf32>
    %c0_20 = arith.constant 0 : index
    %c0_21 = arith.constant 0 : index
    %36 = vector.load %arg10[%c0_20, %c0_21] : memref<2x32xf32, #tpu.memory_space<vmem>>, vector<2x32xf32>
    %c0_22 = arith.constant 0 : index
    %c0_23 = arith.constant 0 : index
    %37 = vector.load %arg11[%c0_22, %c0_23] : memref<2x1xf32, #tpu.memory_space<vmem>>, vector<2x1xf32>
    %cst_24 = arith.constant dense<0.000000e+00> : vector<2x256xf32>
    %38 = tpu.matmul %36, %35, %cst_24 {dimension_numbers = #tpu.dot_dimension_numbers<[1], [0], [0], [1], [0, 0, 1, 1], [], []>} : vector<2x32xf32>, vector<32x256xf32>, vector<2x256xf32> -> vector<2x256xf32>
    %39 = vector.broadcast %37 : vector<2x1xf32> to vector<2x256xf32>
    %40 = arith.addf %38, %39 : vector<2x256xf32>
    %c0_25 = arith.constant 0 : index
    %c0_26 = arith.constant 0 : index
    %41 = vector.load %arg12[%c0_25, %c0_26] : memref<2x256xf32, #tpu.memory_space<vmem>>, vector<2x256xf32>
    tpu.vector_store %arg12[%c0_25, %c0_26], %40 {strides = array<i32>} : memref<2x256xf32, #tpu.memory_space<vmem>>, vector<2x256xf32>,
    return
  }
  func.func @transform_0(%arg0: i32) -> (i32, i32) {
    %c0_i32 = arith.constant 0 : i32
    %c0_i32_0 = arith.constant 0 : i32
    return %c0_i32, %arg0 : i32, i32
  }
  func.func @transform_1(%arg0: i32) -> (i32, i32) {
    %c0_i32 = arith.constant 0 : i32
    %c0_i32_0 = arith.constant 0 : i32
    %c0_i32_1 = arith.constant 0 : i32
    return %c0_i32, %c0_i32_0 : i32, i32
  }
  func.func @transform_2(%arg0: i32) -> (i32, i32) {
    %c0_i32 = arith.constant 0 : i32
    %c0_i32_0 = arith.constant 0 : i32
    %c0_i32_1 = arith.constant 0 : i32
    return %c0_i32, %c0_i32_0 : i32, i32
  }
  func.func @transform_3(%arg0: i32) -> (i32, i32) {
    %c0_i32 = arith.constant 0 : i32
    %c0_i32_0 = arith.constant 0 : i32
    %c0_i32_1 = arith.constant 0 : i32
    return %c0_i32, %c0_i32_0 : i32, i32
  }
  func.func @transform_4(%arg0: i32) -> (i32, i32) {
    %c0_i32 = arith.constant 0 : i32
    %c0_i32_0 = arith.constant 0 : i32
    %c0_i32_1 = arith.constant 0 : i32
    return %c0_i32, %c0_i32_0 : i32, i32
  }
  func.func @transform_5(%arg0: i32) -> (i32, i32) {
    %c0_i32 = arith.constant 0 : i32
    %c0_i32_0 = arith.constant 0 : i32
    %c0_i32_1 = arith.constant 0 : i32
    return %c0_i32, %c0_i32_0 : i32, i32
  }
  func.func @transform_6(%arg0: i32) -> (i32, i32) {
    %c0_i32 = arith.constant 0 : i32
    %c0_i32_0 = arith.constant 0 : i32
    %c0_i32_1 = arith.constant 0 : i32
    return %c0_i32, %c0_i32_0 : i32, i32
  }
  func.func @transform_7(%arg0: i32) -> (i32, i32) {
    %c0_i32 = arith.constant 0 : i32
    %c0_i32_0 = arith.constant 0 : i32
    %c0_i32_1 = arith.constant 0 : i32
    return %c0_i32, %c0_i32_0 : i32, i32
  }
  func.func @transform_8(%arg0: i32) -> (i32, i32) {
    %c0_i32 = arith.constant 0 : i32
    %c0_i32_0 = arith.constant 0 : i32
    %c0_i32_1 = arith.constant 0 : i32
    return %c0_i32, %c0_i32_0 : i32, i32
  }
  func.func @transform_9(%arg0: i32) -> (i32, i32) {
    %c0_i32 = arith.constant 0 : i32
    %c0_i32_0 = arith.constant 0 : i32
    %c0_i32_1 = arith.constant 0 : i32
    return %c0_i32, %c0_i32_0 : i32, i32
  }
  func.func @transform_10(%arg0: i32) -> (i32, i32) {
    %c0_i32 = arith.constant 0 : i32
    %c0_i32_0 = arith.constant 0 : i32
    %c0_i32_1 = arith.constant 0 : i32
    return %c0_i32, %c0_i32_0 : i32, i32
  }
  func.func @transform_11(%arg0: i32) -> (i32, i32) {
    %c0_i32 = arith.constant 0 : i32
    %c0_i32_0 = arith.constant 0 : i32
    return %c0_i32, %arg0 : i32, i32
  }
}

module attributes {stable_mosaic.version = 11 : i64} {
  func.func @kernel(%arg0: i32, %arg1: memref<2x256xf32, #tpu.memory_space<vmem>>, %arg2: memref<16x2xf32, #tpu.memory_space<vmem>>, %arg3: memref<32x16xf32, #tpu.memory_space<vmem>>, %arg4: memref<32x16xf32, #tpu.memory_space<vmem>>, %arg5: memref<32x1xf32, #tpu.memory_space<vmem>>, %arg6: memref<32x32xf32, #tpu.memory_space<vmem>>, %arg7: memref<32x1xf32, #tpu.memory_space<vmem>>, %arg8: memref<32x32xf32, #tpu.memory_space<vmem>>, %arg9: memref<32x1xf32, #tpu.memory_space<vmem>>, %arg10: memref<2x32xf32, #tpu.memory_space<vmem>>, %arg11: memref<2x1xf32, #tpu.memory_space<vmem>>, %arg12: memref<2x256xf32, #tpu.memory_space<vmem>>) attributes {dimension_semantics = [#tpu.dimension_semantics<parallel>], iteration_bounds = array<i64: 8>, scalar_prefetch = 0 : i64, scratch_operands = 0 : i64, tpu.core_type = #tpu.core_type<tc>, window_params = [{transform_indices = @transform_0, window_bounds = array<i64: 2, 256>}, {pipeline_mode = #tpu.pipeline_mode<synchronous>, transform_indices = @transform_1, window_bounds = array<i64: 16, 2>}, {pipeline_mode = #tpu.pipeline_mode<synchronous>, transform_indices = @transform_2, window_bounds = array<i64: 32, 16>}, {pipeline_mode = #tpu.pipeline_mode<synchronous>, transform_indices = @transform_3, window_bounds = array<i64: 32, 16>}, {pipeline_mode = #tpu.pipeline_mode<synchronous>, transform_indices = @transform_4, window_bounds = array<i64: 32, 1>}, {pipeline_mode = #tpu.pipeline_mode<synchronous>, transform_indices = @transform_5, window_bounds = array<i64: 32, 32>}, {pipeline_mode = #tpu.pipeline_mode<synchronous>, transform_indices = @transform_6, window_bounds = array<i64: 32, 1>}, {pipeline_mode = #tpu.pipeline_mode<synchronous>, transform_indices = @transform_7, window_bounds = array<i64: 32, 32>}, {pipeline_mode = #tpu.pipeline_mode<synchronous>, transform_indices = @transform_8, window_bounds = array<i64: 32, 1>}, {pipeline_mode = #tpu.pipeline_mode<synchronous>, transform_indices = @transform_9, window_bounds = array<i64: 2, 32>}, {pipeline_mode = #tpu.pipeline_mode<synchronous>, transform_indices = @transform_10, window_bounds = array<i64: 2, 1>}, {transform_indices = @transform_11, window_bounds = array<i64: 2, 256>}]} {
    %c0 = arith.constant 0 : index
    %c0_0 = arith.constant 0 : index
    %0 = vector.load %arg1[%c0, %c0_0] : memref<2x256xf32, #tpu.memory_space<vmem>>, vector<2x256xf32>
    %c0_1 = arith.constant 0 : index
    %c0_2 = arith.constant 0 : index
    %1 = vector.load %arg2[%c0_1, %c0_2] : memref<16x2xf32, #tpu.memory_space<vmem>>, vector<16x2xf32>
    %2 = vector.extract_strided_slice %1 {offsets = [0, 0], sizes = [16, 1], strides = [1, 1]} : vector<16x2xf32> to vector<16x1xf32>
    %3 = vector.extract_strided_slice %0 {offsets = [0, 0], sizes = [1, 256], strides = [1, 1]} : vector<2x256xf32> to vector<1x256xf32>
    %4 = vector.broadcast %2 : vector<16x1xf32> to vector<16x256xf32>
    %5 = vector.broadcast %3 : vector<1x256xf32> to vector<16x256xf32>
    %6 = arith.mulf %4, %5 : vector<16x256xf32>
    %7 = vector.extract_strided_slice %1 {offsets = [0, 1], sizes = [16, 1], strides = [1, 1]} : vector<16x2xf32> to vector<16x1xf32>
    %8 = vector.extract_strided_slice %0 {offsets = [1, 0], sizes = [1, 256], strides = [1, 1]} : vector<2x256xf32> to vector<1x256xf32>
    %9 = vector.broadcast %7 : vector<16x1xf32> to vector<16x256xf32>
    %10 = vector.broadcast %8 : vector<1x256xf32> to vector<16x256xf32>
    %11 = arith.mulf %9, %10 : vector<16x256xf32>
    %12 = arith.addf %6, %11 : vector<16x256xf32>
    %c0_3 = arith.constant 0 : index
    %c0_4 = arith.constant 0 : index
    %13 = vector.load %arg3[%c0_3, %c0_4] : memref<32x16xf32, #tpu.memory_space<vmem>>, vector<32x16xf32>
    %14 = math.cos %12 : vector<16x256xf32>
    %cst = arith.constant dense<0.000000e+00> : vector<32x256xf32>
    %15 = tpu.matmul %13, %14, %cst {dimension_numbers = #tpu.dot_dimension_numbers<[1], [0], [0], [1], [0, 0, 1, 1], [], []>} : vector<32x16xf32>, vector<16x256xf32>, vector<32x256xf32> -> vector<32x256xf32>
    %c0_5 = arith.constant 0 : index
    %c0_6 = arith.constant 0 : index
    %16 = vector.load %arg4[%c0_5, %c0_6] : memref<32x16xf32, #tpu.memory_space<vmem>>, vector<32x16xf32>
    %17 = math.sin %12 : vector<16x256xf32>
    %cst_7 = arith.constant dense<0.000000e+00> : vector<32x256xf32>
    %18 = tpu.matmul %16, %17, %cst_7 {dimension_numbers = #tpu.dot_dimension_numbers<[1], [0], [0], [1], [0, 0, 1, 1], [], []>} : vector<32x16xf32>, vector<16x256xf32>, vector<32x256xf32> -> vector<32x256xf32>
    %19 = arith.addf %15, %18 : vector<32x256xf32>
    %c0_8 = arith.constant 0 : index
    %c0_9 = arith.constant 0 : index
    %20 = vector.load %arg5[%c0_8, %c0_9] : memref<32x1xf32, #tpu.memory_space<vmem>>, vector<32x1xf32>
    %21 = vector.broadcast %20 : vector<32x1xf32> to vector<32x256xf32>
    %22 = arith.addf %19, %21 : vector<32x256xf32>
    %23 = math.tanh %22 : vector<32x256xf32>
    %c0_10 = arith.constant 0 : index
    %c0_11 = arith.constant 0 : index
    %24 = vector.load %arg6[%c0_10, %c0_11] : memref<32x32xf32, #tpu.memory_space<vmem>>, vector<32x32xf32>
    %c0_12 = arith.constant 0 : index
    %c0_13 = arith.constant 0 : index
    %25 = vector.load %arg7[%c0_12, %c0_13] : memref<32x1xf32, #tpu.memory_space<vmem>>, vector<32x1xf32>
    %cst_14 = arith.constant dense<0.000000e+00> : vector<32x256xf32>
    %26 = tpu.matmul %24, %23, %cst_14 {dimension_numbers = #tpu.dot_dimension_numbers<[1], [0], [0], [1], [0, 0, 1, 1], [], []>} : vector<32x32xf32>, vector<32x256xf32>, vector<32x256xf32> -> vector<32x256xf32>
    %27 = vector.broadcast %25 : vector<32x1xf32> to vector<32x256xf32>
    %28 = arith.addf %26, %27 : vector<32x256xf32>
    %29 = math.tanh %28 : vector<32x256xf32>
    %c0_15 = arith.constant 0 : index
    %c0_16 = arith.constant 0 : index
    %30 = vector.load %arg8[%c0_15, %c0_16] : memref<32x32xf32, #tpu.memory_space<vmem>>, vector<32x32xf32>
    %c0_17 = arith.constant 0 : index
    %c0_18 = arith.constant 0 : index
    %31 = vector.load %arg9[%c0_17, %c0_18] : memref<32x1xf32, #tpu.memory_space<vmem>>, vector<32x1xf32>
    %cst_19 = arith.constant dense<0.000000e+00> : vector<32x256xf32>
    %32 = tpu.matmul %30, %29, %cst_19 {dimension_numbers = #tpu.dot_dimension_numbers<[1], [0], [0], [1], [0, 0, 1, 1], [], []>} : vector<32x32xf32>, vector<32x256xf32>, vector<32x256xf32> -> vector<32x256xf32>
    %33 = vector.broadcast %31 : vector<32x1xf32> to vector<32x256xf32>
    %34 = arith.addf %32, %33 : vector<32x256xf32>
    %35 = math.tanh %34 : vector<32x256xf32>
    %c0_20 = arith.constant 0 : index
    %c0_21 = arith.constant 0 : index
    %36 = vector.load %arg10[%c0_20, %c0_21] : memref<2x32xf32, #tpu.memory_space<vmem>>, vector<2x32xf32>
    %c0_22 = arith.constant 0 : index
    %c0_23 = arith.constant 0 : index
    %37 = vector.load %arg11[%c0_22, %c0_23] : memref<2x1xf32, #tpu.memory_space<vmem>>, vector<2x1xf32>
    %cst_24 = arith.constant dense<0.000000e+00> : vector<2x256xf32>
    %38 = tpu.matmul %36, %35, %cst_24 {dimension_numbers = #tpu.dot_dimension_numbers<[1], [0], [0], [1], [0, 0, 1, 1], [], []>} : vector<2x32xf32>, vector<32x256xf32>, vector<2x256xf32> -> vector<2x256xf32>
    %39 = vector.broadcast %37 : vector<2x1xf32> to vector<2x256xf32>
    %40 = arith.addf %38, %39 : vector<2x256xf32>
    %c0_25 = arith.constant 0 : index
    %c0_26 = arith.constant 0 : index
    %41 = vector.load %arg12[%c0_25, %c0_26] : memref<2x256xf32, #tpu.memory_space<vmem>>, vector<2x256xf32>
    tpu.vector_store %arg12[%c0_25, %c0_26], %40 {strides = array<i32>} : memref<2x256xf32, #tpu.memory_space<vmem>>, vector<2x256xf32>,
    return
  }
  func.func @transform_0(%arg0: i32) -> (i32, i32) {
    %c0_i32 = arith.constant 0 : i32
    %c0_i32_0 = arith.constant 0 : i32
    return %c0_i32, %arg0 : i32, i32
  }
  func.func @transform_1(%arg0: i32) -> (i32, i32) {
    %c0_i32 = arith.constant 0 : i32
    %c0_i32_0 = arith.constant 0 : i32
    %c0_i32_1 = arith.constant 0 : i32
    return %c0_i32, %c0_i32_0 : i32, i32
  }
  func.func @transform_2(%arg0: i32) -> (i32, i32) {
    %c0_i32 = arith.constant 0 : i32
    %c0_i32_0 = arith.constant 0 : i32
    %c0_i32_1 = arith.constant 0 : i32
    return %c0_i32, %c0_i32_0 : i32, i32
  }
  func.func @transform_3(%arg0: i32) -> (i32, i32) {
    %c0_i32 = arith.constant 0 : i32
    %c0_i32_0 = arith.constant 0 : i32
    %c0_i32_1 = arith.constant 0 : i32
    return %c0_i32, %c0_i32_0 : i32, i32
  }
  func.func @transform_4(%arg0: i32) -> (i32, i32) {
    %c0_i32 = arith.constant 0 : i32
    %c0_i32_0 = arith.constant 0 : i32
    %c0_i32_1 = arith.constant 0 : i32
    return %c0_i32, %c0_i32_0 : i32, i32
  }
  func.func @transform_5(%arg0: i32) -> (i32, i32) {
    %c0_i32 = arith.constant 0 : i32
    %c0_i32_0 = arith.constant 0 : i32
    %c0_i32_1 = arith.constant 0 : i32
    return %c0_i32, %c0_i32_0 : i32, i32
  }
  func.func @transform_6(%arg0: i32) -> (i32, i32) {
    %c0_i32 = arith.constant 0 : i32
    %c0_i32_0 = arith.constant 0 : i32
    %c0_i32_1 = arith.constant 0 : i32
    return %c0_i32, %c0_i32_0 : i32, i32
  }
  func.func @transform_7(%arg0: i32) -> (i32, i32) {
    %c0_i32 = arith.constant 0 : i32
    %c0_i32_0 = arith.constant 0 : i32
    %c0_i32_1 = arith.constant 0 : i32
    return %c0_i32, %c0_i32_0 : i32, i32
  }
  func.func @transform_8(%arg0: i32) -> (i32, i32) {
    %c0_i32 = arith.constant 0 : i32
    %c0_i32_0 = arith.constant 0 : i32
    %c0_i32_1 = arith.constant 0 : i32
    return %c0_i32, %c0_i32_0 : i32, i32
  }
  func.func @transform_9(%arg0: i32) -> (i32, i32) {
    %c0_i32 = arith.constant 0 : i32
    %c0_i32_0 = arith.constant 0 : i32
    %c0_i32_1 = arith.constant 0 : i32
    return %c0_i32, %c0_i32_0 : i32, i32
  }
  func.func @transform_10(%arg0: i32) -> (i32, i32) {
    %c0_i32 = arith.constant 0 : i32
    %c0_i32_0 = arith.constant 0 : i32
    %c0_i32_1 = arith.constant 0 : i32
    return %c0_i32, %c0_i32_0 : i32, i32
  }
  func.func @transform_11(%arg0: i32) -> (i32, i32) {
    %c0_i32 = arith.constant 0 : i32
    %c0_i32_0 = arith.constant 0 : i32
    return %c0_i32, %arg0 : i32, i32
  }
}

</mosaic_0001>

<bundles_post_ra>
// kernel: tpu_custom_call.1
= control target key start
LH: loop header
LB: loop body
LE: loop exit
PB: predicated region body
PF: predicated region fallthrough
CT: control target
= control target key end

     0   :  { %s2850_s0 = inlined_call_operand.vmem [shape: f32[2,2048], index: 0, kind: input, shape index: {}]   ;;  %s2851_s1 = inlined_call_operand.vmem [shape: f32[16,2], index: 1, kind: input, shape index: {}]   ;;  %s2852_s2 = inlined_call_operand.vmem [shape: f32[32,16], index: 2, kind: input, shape index: {}]   ;;  %s2853_s3 = inlined_call_operand.vmem [shape: f32[32,16], index: 3, kind: input, shape index: {}]   ;;  %s2854_s4 = inlined_call_operand.vmem [shape: f32[32,1], index: 4, kind: input, shape index: {}]   ;;  %s2855_s5 = inlined_call_operand.vmem [shape: f32[32,32], index: 5, kind: input, shape index: {}]   ;;  %s2856_s6 = inlined_call_operand.vmem [shape: f32[32,1], index: 6, kind: input, shape index: {}]   ;;  %s2857_s7 = inlined_call_operand.vmem [shape: f32[32,32], index: 7, kind: input, shape index: {}]   ;;  %s2858_s8 = inlined_call_operand.vmem [shape: f32[32,1], index: 8, kind: input, shape index: {}]   ;;  %s2859_s9 = inlined_call_operand.vmem [shape: f32[2,32], index: 9, kind: input, shape index: {}]   ;;  %s2860_s10 = inlined_call_operand.vmem [shape: f32[2,1], index: 10, kind: input, shape index: {}]   ;;  %s2861_s11 = inlined_call_operand.hbm [shape: f32[2,2048], index: 11, kind: output, shape index: {}]  }
   0x1   :  { %2862 = sst [smem:[#allocation5_spill]] %s2850_s0 }
   0x2   :  { %2863 = sst [smem:[#allocation6_spill]] %s2851_s1 }
   0x3   :  { %16 = vsyncpa [#allocation3], 0 }
   0x4   :  { %18 = vsyncpa [#allocation3 + $0x1], 0  ;;  %s2308_s17 = smov 0   ;;  %s2310_s18 = smov 0  }
   0x5   :  { %s2312_s19 = smov 0   ;;  %s2314_s20 = smov 0  }
   0x6 LB: > { %s2329_s21 = sadd.s32 4294967295, %s2236_s20   ;;  %s1979_s22 = sadd.s32 4294967294, %s2236_s20   ;;  %s2236_s20 = sphi %s2314_s20, %s2875_s20   ;;  %s2232_s19 = sphi %s2312_s19, %s2874_s19   ;;  %s2228_s18 = sphi %s2310_s18, %s2873_s18   ;;  %s2224_s17 = sphi %s2308_s17, %s2872_s17  }
   0x7   : > { %s2333_s23 = sadd.s32 1, %s2236_s20   ;;  %s267_s24 = sadd.s32 1, %s2232_s19 }
   0x8   : > { %s264_s25 = ssub.s32 %s2236_s20, %s2333_s23  ;;  %p277_p0 = scmp.ne.s32.totalorder %s2232_s19, %s2228_s18 }
   0x9   : > { %p265_p1 = scmp.eq.s32.totalorder %s264_s25, 0  ;;  %p278_p2 = scmp.eq.s32.totalorder %s2329_s21, 7 }
   0xa   : > { %p283_p3 = scmp.ne.s32.totalorder %s2228_s18, %s2224_s17  ;;  %p284_p4 = scmp.eq.s32.totalorder %s1979_s22, 7 }
   0xb   : > { %s2344_s26 = scalar_select %p265_p1, %s2232_s19, %s267_s24  }
   0xc   : > { %p2346_p5 = por %p278_p2, %p277_p0  ;;  %p2350_p6 = por %p284_p4, %p283_p3 }
   0xd   : > { %p1982_p7 = scmp.ge.s32.totalorder %s2236_s20, 1  ;;  %p341_p8 = scmp.lt.s32.totalorder %s2236_s20, 9 }
   0xf   : > { %p342_p9 = pnand %p1982_p7, %p341_p8 }
  0x10   : > { %s2866_s1 = sld [smem:[#allocation6_spill]] (!%p342_p9)  ;;  %s1984_s14 = sshll.u32 (!%p342_p9), %s2329_s21, 1 }
  0x11   : > { %345 = sbr.rel (%p342_p9) target bundleno = 1207 (0x4b7), region = 64  ;;  %p382_p10 = scmp.lt.s32.totalorder (!%p342_p9), %s1984_s14, 15 }
  0x12   : > { %s2867_s0 = sld [smem:[#allocation5_spill]] (!%p342_p9)  ;;  %s378_s25 = sand.u32 (!%p342_p9), 1, %s2228_s18  }
  0x13   : > { %s1983_s29 = sshll.u32 (!%p342_p9), %s378_s25, 2  ;;  %s2041_s30 = sshll.u32 (!%p342_p9), %s2329_s21, 6 }
  0x14   : > { %s380_s12 = scalar_lea.vmem (!%p342_p9), [#allocation2], %s1983_s29  ;;  %s1918_s16 = scalar_lea.hbm (!%p342_p9), %s2861_s11, %s2041_s30 }
  0x15   : > { %s1920_s13 = sshll.u32 (!%p342_p9), %s380_s12, 4  ;;  %s1906_s22 = scalar_lea.sflag (!%p342_p9), [#allocation3], %s378_s25  ;;  %s1921_s13 = int_to_ptr.vmem [resolvable:$true] %s1920_s13 }
  0x16   : > { %v390_v0 = vld [vmem:[%s2866_s1 + $0x8] sm:$0xff]  ;;  %v389_v1 = vld [vmem:[%s2866_s1] sm:$0xff]  ;;  %v2238_v2 = vmov 0   ;;  %v2239_v3 = vmov 1   ;;  %s2877_s14 = smov (!%p382_p10, %s1984_s14), 15  ;;  %v402_v4 = vlaneseq }
  0x17   : > { %2108 = vset.pattern.permute.xlu1 %v2238_v2  ;;  %2106 = vset.pattern.permute.xlu0 %v2238_v2  ;;  %s1985_s15 = sshll.u32 %s2877_s14, 1 }
  0x18   : > { %398 = vperm.xlu0 %2106, %v390_v0   ;;  %393 = vperm.xlu1 %2108, %v389_v1   ;;  %v403_v5 = vshrl.u32 %v402_v4, 7  ;;  %s385_s24 = scalar_lea.vmem %s2867_s0, %s1985_s15  ;;  %v2241_v4 = vmov 2475754826   ;;  %s2247_s0 = smov [#allocation2]  }
  0x19   : > { %v388_v8 = vld [vmem:[%s385_s24] sm:$0xf]  ;;  %s2176_s24 = scalar_lea.vmem %s1921_s13, 64  ;;  %s2180_s1 = sshll.u32 %s2247_s0, 4  ;;  %s2181_s1 = int_to_ptr.vmem [resolvable:$false] %s2180_s1 }
  0x1a   : > { %v404_v6 = vsub.s32 0, %v403_v5  ;;  %v408_v7 = vsub.s32 2, %v403_v5  ;;  %v434_v9 = vsub.s32 1, %v403_v5  ;;  %v438_v10 = vsub.s32 3, %v403_v5  ;;  %p2177_p11 = scmp.ne.s32.totalorder %s1921_s13, %s2176_s24  ;;  %s2182_s21 = scalar_lea.vmem %s2181_s1, 128 }
  0x1b   : > { %p2183_p0 = scmp.lt.s32.totalorder %s1921_s13, %s2181_s1  ;;  %p2184_p1 = scmp.lt.s32.totalorder %s2182_s21, %s2176_s24 }
  0x1c   : > { %2107 = vset.pattern.permute.xlu0 %v2239_v3  ;;  %2109 = vset.pattern.permute.xlu1 %v2239_v3  ;;  %v405_v11 = vrot.slane %v388_v8, %v404_v6  ;;  %v409_v12 = vrot.slane %v388_v8, %v408_v7  ;;  %v435_v13 = vrot.slane %v388_v8, %v434_v9  ;;  %v2242_v7 = vmov 2131351028   ;;  %p2178_p12 = pnand %p2177_p11, %p2346_p5 }
  0x1d   : > { %429 = vperm.xlu0 %2107, %v390_v0   ;;  %425 = vperm.xlu1 %2109, %v389_v1   ;;  %v439_v14 = vrot.slane %v388_v8, %v438_v10  ;;  %v2243_v10 = vmov 2102212464   ;;  %p2185_p2 = por %p2184_p1, %p2183_p0 }
  0x1e   : > { %v415_v17 = vrot.slane %v405_v11, %v404_v6  ;;  %v419_v18 = vrot.slane %v409_v12, %v404_v6  ;;  %v445_v19 = vrot.slane %v435_v13, %v434_v9  ;;  %v2244_v13 = vmov 920167782   ;;  %p2179_p13 = pneg %p2178_p12 }
  0x1f   : > { %v449_v20 = vrot.slane %v439_v14, %v434_v9 }
  0x20   : > { %p2186_p3 = pnand %p2185_p2, %p2179_p13 }
  0x21   : > { %2110 = vset.pattern.permute.xlu1 %v2238_v2  ;;  %2111 = vset.pattern.permute.xlu0 %v2238_v2  ;;  %v2240_v2 = vmov 683565275  }
  0x93   : > { %v399_v15 = vpop.permute.xlu0 %398  ;;  %v394_v16 = vpop.permute.xlu1 %393 }
  0x94   : > { %v422_v21 = vmul.f32 %v415_v17, %v399_v15  ;;  %v423_v22 = vmul.f32 %v419_v18, %v399_v15  ;;  %v420_v23 = vmul.f32 %v415_v17, %v394_v16  ;;  %v421_v24 = vmul.f32 %v419_v18, %v394_v16 }
  0x95   : > { %v2245_v16 = vmov 1326507024  }
  0x98   : > { %v430_v25 = vpop.permute.xlu0 %429  ;;  %v426_v26 = vpop.permute.xlu1 %425 }
  0x99   : > { %v452_v27 = vmul.f32 %v445_v19, %v430_v25  ;;  %v453_v28 = vmul.f32 %v449_v20, %v430_v25  ;;  %v450_v29 = vmul.f32 %v445_v19, %v426_v26  ;;  %v451_v30 = vmul.f32 %v449_v20, %v426_v26 }
  0x9b   : > { %v2366_v31 = vadd.f32 %v452_v27, %v422_v21  ;;  %v2368_v32 = vadd.f32 %v453_v28, %v423_v22  ;;  %v2370_v33 = vadd.f32 %v450_v29, %v420_v23  ;;  %v2372_v34 = vadd.f32 %v451_v30, %v421_v24 }
  0x9d   : > { %v671_v35 = vand.u32 2139095040, %v2366_v31  ;;  %v774_v36 = vand.u32 2139095040, %v2368_v32  ;;  %v465_v37 = vand.u32 2139095040, %v2370_v33  ;;  %v568_v38 = vand.u32 2139095040, %v2372_v34 }
  0x9e   : > { %v771_v39 = vand.u32 2147483647, %v2368_v32  ;;  %v668_v48 = vand.u32 2147483647, %v2366_v31  ;;  %vm773_vm14 = vcmp.lt.s32.totalorder %v2368_v32, 0 }
  0x9f   : > { %v672_v40 = vshrl.u32 %v671_v35, 23  ;;  %v775_v41 = vshrl.u32 %v774_v36, 23  ;;  %v569_v42 = vshrl.u32 %v568_v38, 23  ;;  %v466_v43 = vshrl.u32 %v465_v37, 23 }
  0xa0   : > { %v778_v44 = vand.u32 8388607, %v771_v39  ;;  %v2384_v54 = vand.u32 8388607, %v668_v48  ;;  %vm2521_vm15 = vcmp.le.f32.partialorder %v771_v39, 0.7853982 }
  0xa1   : > { %v1994_v45 = vadd.s32 4294967169, %v672_v40  ;;  %v1998_v46 = vadd.s32 4294967169, %v775_v41  ;;  %v1990_v47 = vadd.s32 4294967169, %v569_v42  ;;  %v1986_v52 = vadd.s32 4294967169, %v466_v43 }
  0xa2   : > { %v779_v53 = vor.u32 8388608, %v778_v44  ;;  %v676_v63 = vor.u32 8388608, %v2384_v54 }
  0xa3   : > { %v678_v49 = vadd.s32 1, %v1994_v45  ;;  %v781_v50 = vadd.s32 1, %v1998_v46  ;;  %v575_v51 = vadd.s32 1, %v1990_v47  ;;  %v2386_v58 = vadd.s32 1, %v1986_v52 }
  0xa4   : > { %v2388_v59 = vshll.u32 %v779_v53, 8 }
  0xa5   : > { %vm679_vm0 = vcmp.gt.s32.totalorder %v678_v49, 0  ;;  %vm782_vm1 = vcmp.gt.s32.totalorder %v781_v50, 0  ;;  %vm576_vm2 = vcmp.gt.s32.totalorder %v575_v51, 0  ;;  %vm473_vm12 = vcmp.gt.s32.totalorder %v2386_v58, 0 }
  0xa6   : > { %v680_v55 = vsel %vm679_vm0, %v678_v49, 0  ;;  %v783_v56 = vsel %vm782_vm1, %v781_v50, 0  ;;  %v2390_v62 = vsel %vm576_vm2, %v575_v51, 0 }
  0xa7   : > { %v785_v57 = vand.u32 31, %v783_v56  ;;  %v682_v60 = vand.u32 31, %v680_v55  ;;  %v2393_v0 = vshrl.u32 %v680_v55, 5  ;;  %v784_v1 = vshrl.u32 %v783_v56, 5 }
  0xa9   : > { %v786_v61 = vsub.s32 32, %v785_v57  ;;  %v788_v3 = vshll.u32 %v2240_v2, %v785_v57  ;;  %v791_v5 = vshll.u32 %v2241_v4, %v785_v57  ;;  %v794_v9 = vshll.u32 %v2242_v7, %v785_v57 }
  0xaa   : > { %v797_v12 = vshll.u32 %v2243_v10, %v785_v57  ;;  %v800_v15 = vshll.u32 %v2244_v13, %v785_v57  ;;  %v683_v18 = vsub.s32 32, %v682_v60  ;;  %vm803_vm3 = vcmp.lt.s32.totalorder %v784_v1, 1 }
  0xab   : > { %v789_v6 = vshrl.u32 %v2241_v4, %v786_v61  ;;  %v792_v8 = vshrl.u32 %v2242_v7, %v786_v61  ;;  %v795_v11 = vshrl.u32 %v2243_v10, %v786_v61  ;;  %v798_v14 = vshrl.u32 %v2244_v13, %v786_v61 }
  0xac   : > { %v801_v17 = vshrl.u32 %v2245_v16, %v786_v61  ;;  %vm806_vm4 = vcmp.lt.s32.totalorder %v784_v1, 4  ;;  %v787_v24 = vshrl.u32 %v2240_v2, %v786_v61  ;;  %vm804_vm5 = vcmp.lt.s32.totalorder %v784_v1, 2 }
  0xad   : > { %v790_v19 = vor.u32 %v789_v6, %v788_v3  ;;  %v793_v20 = vor.u32 %v792_v8, %v791_v5  ;;  %v796_v21 = vor.u32 %v795_v11, %v794_v9  ;;  %v799_v22 = vor.u32 %v798_v14, %v797_v12 }
  0xae   : > { %v802_v23 = vor.u32 %v801_v17, %v800_v15  ;;  %vm805_vm6 = vcmp.lt.s32.totalorder %v784_v1, 3  ;;  %v685_v41 = vshll.u32 %v2240_v2, %v682_v60  ;;  %v686_v42 = vshrl.u32 %v2241_v4, %v683_v18 }
  0xaf   : > { %v808_v25 = vsel %vm806_vm4, %v796_v21, 2102212464  ;;  %v811_v26 = vsel %vm803_vm3, %v790_v19, %v793_v20  ;;  %v815_v27 = vsel %vm803_vm3, %v793_v20, %v796_v21  ;;  %v812_v28 = vsel %vm806_vm4, %v799_v22, 920167782 }
  0xb0   : > { %v816_v29 = vsel %vm806_vm4, %v802_v23, 1326507024  ;;  %v807_v30 = vsel %vm803_vm3, %v787_v24, %v790_v19  ;;  %v809_v35 = vsel %vm805_vm6, %v793_v20, %v808_v25  ;;  %v813_v36 = vsel %vm805_vm6, %v796_v21, %v812_v28 }
  0xb1   : > { %v817_v37 = vsel %vm805_vm6, %v799_v22, %v816_v29  ;;  %v814_v38 = vsel %vm804_vm5, %v811_v26, %v813_v36  ;;  %v810_v47 = vsel %vm804_vm5, %v807_v30, %v809_v35  ;;  %v684_v49 = vshrl.u32 %v2240_v2, %v683_v18 }
  0xb2   : > { %v818_v40 = vsel %vm804_vm5, %v815_v27, %v817_v37  ;;  %v2413_v45 = vmul.u32.u64.low %v2388_v59, %v814_v38  ;;  %v2414_v46 = vmul.u32.u64.high %v2388_v59, %v814_v38, %v2413_v45  ;;  %v688_v50 = vshll.u32 %v2241_v4, %v682_v60  ;;  %v1499_v37 = vld [vmem:[%s2854_s4 + $0x10] sm:$0xff] }
  0xb3   : > { %v2409_v43 = vmul.u32.u64.low %v2388_v59, %v818_v40  ;;  %v2410_v44 = vmul.u32.u64.high %v2388_v59, %v818_v40, %v2409_v43  ;;  %v689_v51 = vshrl.u32 %v2242_v7, %v683_v18  ;;  %v687_v52 = vor.u32 %v686_v42, %v685_v41  ;;  %v1498_v40 = vld [vmem:[%s2854_s4 + $0x8] sm:$0xff]  ;;  %1513 = vperm.xlu0 %2111, %v1499_v37  }
  0xb4   : > { %v691_v53 = vshll.u32 %v2242_v7, %v682_v60  ;;  %v692_v55 = vshrl.u32 %v2243_v10, %v683_v18  ;;  %v695_v56 = vshrl.u32 %v2244_v13, %v683_v18  ;;  %v694_v61 = vshll.u32 %v2243_v10, %v682_v60 }
  0xb5   : > { %v690_v57 = vor.u32 %v689_v51, %v688_v50  ;;  %v697_v1 = vshll.u32 %v2244_v13, %v682_v60  ;;  %v698_v3 = vshrl.u32 %v2245_v16, %v683_v18  ;;  %v826_v5 = vmul.u32 %v2388_v59, %v810_v47 }
  0xb6   : > { %vm828_vm7 = vc.u32 %v2410_v44, %v2413_v45  ;;  %v829_v6 = vadd.s32 1, %v2414_v46  ;;  %v693_v8 = vor.u32 %v692_v55, %v691_v53  ;;  %v696_v9 = vor.u32 %v695_v56, %v694_v61  ;;  %v1497_v53 = vld [vmem:[%s2854_s4] sm:$0xff]  ;;  %v1542_v61 = vld [vmem:[%s2856_s6 + $0x8] sm:$0xff] }
  0xb7   : > { %v699_v11 = vor.u32 %v698_v3, %v697_v1  ;;  %vm700_vm8 = vcmp.lt.s32.totalorder %v2393_v0, 1  ;;  %vm703_vm9 = vcmp.lt.s32.totalorder %v2393_v0, 4  ;;  %vm701_vm10 = vcmp.lt.s32.totalorder %v2393_v0, 2 }
  0xb8   : > { %v830_v12 = vsel %vm828_vm7, %v829_v6, %v2414_v46  ;;  %v705_v60 = vsel %vm703_vm9, %v693_v8, 2102212464  ;;  %v708_v14 = vsel %vm700_vm8, %v687_v52, %v690_v57  ;;  %vm702_vm11 = vcmp.lt.s32.totalorder %v2393_v0, 3  ;;  %v1544_v0 = vld [vmem:[%s2856_s6 + $0x18] sm:$0xff] }
  0xb9   : > { %v831_v15 = vadd.s32 %v830_v12, %v826_v5  ;;  %v709_v59 = vsel %vm703_vm9, %v696_v9, 920167782  ;;  %v712_v17 = vsel %vm700_vm8, %v690_v57, %v693_v8  ;;  %v704_v18 = vsel %vm700_vm8, %v684_v49, %v687_v52  ;;  %1562 = vperm.xlu0 %2111, %v1544_v0  }
  0xba   : > { %v710_v19 = vsel %vm702_vm11, %v693_v8, %v709_v59  ;;  %v713_v20 = vsel %vm703_vm9, %v699_v11, 1326507024  ;;  %v716_v21 = vshll.u32 %v676_v63, 8  ;;  %v706_v23 = vsel %vm702_vm11, %v690_v57, %v705_v60  ;;  %v1500_v63 = vld [vmem:[%s2854_s4 + $0x18] sm:$0xff]  ;;  %v1543_v59 = vld [vmem:[%s2856_s6 + $0x10] sm:$0xff] }
  0xbb   : > { %v832_v22 = vadd.s32 536870912, %v831_v15  ;;  %v711_v24 = vsel %vm701_vm10, %v708_v14, %v710_v19  ;;  %v714_v25 = vsel %vm702_vm11, %v696_v9, %v713_v20  ;;  %v579_v26 = vand.u32 31, %v2390_v62  ;;  %1518 = vperm.xlu1 %2110, %v1500_v63   ;;  %v1682_v20 = vld [vmem:[%s2858_s8 + $0x18] sm:$0xff] }
  0xbc   : > { %v715_v27 = vsel %vm701_vm10, %v712_v17, %v714_v25  ;;  %v2442_v28 = vmul.u32.u64.low %v716_v21, %v711_v24  ;;  %v2443_v29 = vmul.u32.u64.high %v716_v21, %v711_v24, %v2442_v28  ;;  %v707_v36 = vsel %vm701_vm10, %v704_v18, %v706_v23 }
  0xbd   : > { %v2446_v30 = vshrl.u32 %v832_v22, 30  ;;  %v2448_v35 = vmul.u32.u64.low %v716_v21, %v715_v27  ;;  %v2449_v54 = vmul.u32.u64.high %v716_v21, %v715_v27, %v2448_v35  ;;  %v2464_v41 = vsub.s32 32, %v579_v26  ;;  %1552 = vperm.xlu0 %2111, %v1542_v61  }
  0xbe   : > { %v726_v42 = vadd.s32 1, %v2443_v29  ;;  %v723_v46 = vmul.u32 %v716_v21, %v707_v36  ;;  %v565_v47 = vand.u32 2147483647, %v2372_v34  ;;  %v2477_v50 = vsel %vm473_vm12, %v2386_v58, 0  ;;  %v1541_v36 = vld [vmem:[%s2856_s6] sm:$0xff] }
  0xbf   : > { %v834_v38 = vshll.u32 %v2446_v30, 30  ;;  %vm725_vm13 = vc.u32 %v2449_v54, %v2442_v28  ;;  %1508 = vperm.xlu1 %2110, %v1498_v40   ;;  %v2484_v55 = vshrl.u32 %v2390_v62, 5  ;;  %v583_v56 = vshrl.u32 %v2241_v4, %v2464_v41 }
  0xc0   : > { %v727_v49 = vsel %vm725_vm13, %v726_v42, %v2443_v29  ;;  %v591_v57 = vshll.u32 %v2243_v10, %v579_v26  ;;  %v592_v58 = vshrl.u32 %v2244_v13, %v2464_v41  ;;  %v2497_v3 = vand.u32 8388607, %v565_v47 }
  0xc1   : > { %v2470_v43 = vsub.s32 %v831_v15, %v834_v38  ;;  %v728_v52 = vadd.s32 %v727_v49, %v723_v46  ;;  %v586_v62 = vshrl.u32 %v2242_v7, %v2464_v41  ;;  %v589_v5 = vshrl.u32 %v2243_v10, %v2464_v41  ;;  %1700 = vperm.xlu0 %2111, %v1682_v20  }
  0xc2   : > { %v582_v8 = vshll.u32 %v2240_v2, %v579_v26  ;;  %v593_v9 = vor.u32 %v592_v58, %v591_v57  ;;  %v595_v11 = vshrl.u32 %v2245_v16, %v2464_v41  ;;  %v857_v60 = vsub.s32 4, %v2446_v30  ;;  %v1681_v57 = vld [vmem:[%s2858_s8 + $0x10] sm:$0xff] }
  0xc3   : > { %v837_v51 = vsub.s32 0, %v2470_v43  ;;  %v729_v6 = vadd.s32 536870912, %v728_v52  ;;  %1503 = vperm.xlu1 %2110, %v1497_v53   ;;  %v585_v14 = vshll.u32 %v2241_v4, %v579_v26  ;;  %v588_v15 = vshll.u32 %v2242_v7, %v579_v26 }
  0xc4   : > { %v584_v18 = vor.u32 %v583_v56, %v582_v8  ;;  %v594_v19 = vshll.u32 %v2244_v13, %v579_v26  ;;  %vm600_vm0 = vcmp.lt.s32.totalorder %v2484_v55, 4  ;;  %v2527_v25 = vand.u32 31, %v2477_v50 }
  0xc5   : > { %v1999_v1 = vmin.u32 %v837_v51, %v2470_v43  ;;  %v2513_v17 = vshrl.u32 %v729_v6, 30  ;;  %v587_v23 = vor.u32 %v586_v62, %v585_v14  ;;  %v590_v24 = vor.u32 %v589_v5, %v588_v15 }
  0xc6   : > { %v596_v27 = vor.u32 %v595_v11, %v594_v19  ;;  %v606_v29 = vsel %vm600_vm0, %v593_v9, 920167782  ;;  %v827_v39 = vadd.s32 %v2413_v45, %v2410_v44  ;;  %v858_v35 = vsel %vm773_vm14, %v857_v60, %v2446_v30  ;;  %v1680_v44 = vld [vmem:[%s2858_s8 + $0x8] sm:$0xff] }
  0xc7   : > { %v839_v12 = vclz %v1999_v1  ;;  %v731_v26 = vshll.u32 %v2513_v17, 30  ;;  %1557 = vperm.xlu1 %2110, %v1543_v59   ;;  %v573_v63 = vor.u32 8388608, %v2497_v3  ;;  %vm597_vm2 = vcmp.lt.s32.totalorder %v2484_v55, 1  ;;  %1690 = vperm.xlu0 %2111, %v1680_v44   ;;  %v1813_v3 = vld [vmem:[%s2860_s10] sm:$0x3] }
  0xc8   : > { %vm599_vm3 = vcmp.lt.s32.totalorder %v2484_v55, 3  ;;  %v605_v40 = vsel %vm597_vm2, %v584_v18, %v587_v23  ;;  %vm598_vm4 = vcmp.lt.s32.totalorder %v2484_v55, 2  ;;  %v609_v46 = vsel %vm597_vm2, %v587_v23, %v590_v24  ;;  %v1679_v59 = vld [vmem:[%s2858_s8] sm:$0xff] }
  0xc9   : > { %v2000_v22 = vadd.s32 4294967294, %v839_v12  ;;  %v2541_v38 = vsub.s32 %v728_v52, %v731_v26  ;;  %v607_v42 = vsel %vm599_vm3, %v590_v24, %v606_v29  ;;  %v610_v49 = vsel %vm600_vm0, %v596_v27, 1326507024 }
  0xca   : > { %v611_v56 = vsel %vm599_vm3, %v593_v9, %v610_v49  ;;  %v581_v61 = vshrl.u32 %v2240_v2, %v2464_v41  ;;  %v602_v1 = vsel %vm600_vm0, %v590_v24, 2102212464  ;;  %v613_v8 = vshll.u32 %v573_v63, 8 }
  0xcb   : > { %vm2001_vm1 = vcmp.lt.s32.totalorder %v2000_v22, 0  ;;  %v734_v0 = vsub.s32 0, %v2541_v38  ;;  %1547 = vperm.xlu1 %2110, %v1541_v36   ;;  %v612_v6 = vsel %vm598_vm4, %v609_v46, %v611_v56  ;;  %v860_v9 = vsel %vm2521_vm15, 0, %v858_v35  ;;  %1816 = vperm.xlu0 %2111, %v1813_v3  }
  0xcc   : > { %v842_v37 = vsel %vm2001_vm1, 0, %v2000_v22  ;;  %v601_v11 = vsel %vm597_vm2, %v581_v61, %v584_v18  ;;  %v603_v60 = vsel %vm599_vm3, %v587_v23, %v602_v1  ;;  %v2593_v18 = vshrl.u32 %v2477_v50, 5 }
  0xcd   : > { %v843_v45 = vsub.s32 32, %v842_v37  ;;  %v847_v30 = vsub.s32 4294967266, %v842_v37  ;;  %v844_v51 = vshll.u32 %v2470_v43, %v842_v37  ;;  %v1995_v58 = vmin.u32 %v734_v0, %v2541_v38 }
  0xce   : > { %v608_v43 = vsel %vm598_vm4, %v605_v40, %v607_v42  ;;  %v2582_v14 = vmul.u32.u64.low %v613_v8, %v612_v6  ;;  %v2583_v15 = vmul.u32.u64.high %v613_v8, %v612_v6, %v2582_v14  ;;  %v477_v24 = vsub.s32 32, %v2527_v25 }
  0xcf   : > { %v845_v52 = vshrl.u32 %v827_v39, %v843_v45  ;;  %v848_v53 = vadd.s32 127, %v847_v30  ;;  %v736_v41 = vclz %v1995_v58  ;;  %1695 = vperm.xlu1 %2110, %v1681_v57   ;;  %v1283_v27 = vadd.s32 3, %v860_v9 }
  0xd0   : > { %v2588_v20 = vmul.u32.u64.low %v613_v8, %v608_v43  ;;  %v2589_v22 = vmul.u32.u64.high %v613_v8, %v608_v43, %v2588_v20  ;;  %v724_v29 = vadd.s32 %v2442_v28, %v2449_v54  ;;  %v604_v39 = vsel %vm598_vm4, %v601_v11, %v603_v60 }
  0xd1   : > { %v846_v62 = vor.u32 %v845_v52, %v844_v51  ;;  %v849_v5 = vshll.u32 %v848_v53, 23  ;;  %v1996_v19 = vadd.s32 4294967294, %v736_v41  ;;  %v2600_v63 = vand.u32 3, %v860_v9 }
  0xd2   : > { %vm622_vm6 = vc.u32 %v2583_v15, %v2588_v20  ;;  %v754_v44 = vsub.s32 4, %v2513_v17  ;;  %v623_v45 = vadd.s32 1, %v2589_v22  ;;  %v620_v28 = vmul.u32 %v613_v8, %v604_v39 }
  0xd3   : > { %v850_v12 = vor.u32 4788187, %v849_v5  ;;  %v853_v23 = vcvt.s32.f32 %v846_v62  ;;  %vm1997_vm5 = vcmp.lt.s32.totalorder %v1996_v19, 0  ;;  %1685 = vperm.xlu1 %2110, %v1679_v59   ;;  %v462_v54 = vand.u32 2147483647, %v2370_v33 }
  0xd4   : > { %v739_v36 = vsel %vm1997_vm5, 0, %v1996_v19  ;;  %v480_v55 = vshrl.u32 %v2241_v4, %v477_v24  ;;  %v624_v46 = vsel %vm622_vm6, %v623_v45, %v2589_v22  ;;  %v479_v52 = vshll.u32 %v2240_v2, %v2527_v25 }
  0xd5   : > { %v851_v26 = vand.u32 2147483647, %v850_v12  ;;  %v740_v50 = vsub.s32 32, %v739_v36  ;;  %v744_v37 = vsub.s32 4294967266, %v739_v36  ;;  %v741_v40 = vshll.u32 %v2541_v38, %v739_v36 }
  0xd6   : > { %v625_v51 = vadd.s32 %v624_v46, %v620_v28  ;;  %v483_v53 = vshrl.u32 %v2242_v7, %v477_v24  ;;  %v482_v38 = vshll.u32 %v2241_v4, %v2527_v25  ;;  %v485_v1 = vshll.u32 %v2242_v7, %v2527_v25 }
  0xd7   : > { %v854_v35 = vmul.f32 %v853_v23, %v851_v26  ;;  %v742_v42 = vshrl.u32 %v724_v29, %v740_v50  ;;  %v745_v0 = vadd.s32 127, %v744_v37  ;;  %v486_v43 = vshrl.u32 %v2243_v10, %v477_v24 }
  0xd8   : > { %v626_v61 = vadd.s32 536870912, %v625_v51  ;;  %v478_v62 = vshrl.u32 %v2240_v2, %v477_v24  ;;  %v481_v5 = vor.u32 %v480_v55, %v479_v52  ;;  %v484_v21 = vor.u32 %v483_v53, %v482_v38 }
  0xd9   : > { %v855_v30 = vxor.u32 2147483648, %v854_v35  ;;  %v743_v57 = vor.u32 %v742_v42, %v741_v40  ;;  %v746_v58 = vshll.u32 %v745_v0, 23  ;;  %v487_v8 = vor.u32 %v486_v43, %v485_v1 }
  0xda   : > { %v2624_v6 = vshrl.u32 %v626_v61, 30  ;;  %v489_v9 = vshrl.u32 %v2244_v13, %v477_v24  ;;  %v488_v11 = vshll.u32 %v2243_v10, %v2527_v25  ;;  %v492_v7 = vshrl.u32 %v2245_v16, %v477_v24 }
  0xdb   : > { %v856_v49 = vsel %vm773_vm14, %v855_v30, %v854_v35  ;;  %v747_v3 = vor.u32 4788187, %v746_v58  ;;  %v750_v4 = vcvt.s32.f32 %v743_v57  ;;  %v469_v60 = vand.u32 8388607, %v462_v54 }
  0xdc   : > { %v859_v56 = vsel %vm2521_vm15, %v2368_v32, %v856_v49  ;;  %v628_v12 = vshll.u32 %v2624_v6, 30  ;;  %v491_v2 = vshll.u32 %v2244_v13, %v2527_v25  ;;  %vm494_vm7 = vcmp.lt.s32.totalorder %v2593_v18, 1 }
  0xdd   : > { %2112 = vcosq.f32 %v859_v56  ;;  %v748_v41 = vand.u32 2147483647, %v747_v3  ;;  %v490_v59 = vor.u32 %v489_v9, %v488_v11  ;;  %vm497_vm8 = vcmp.lt.s32.totalorder %v2593_v18, 4 }
  0xde   : > { %2114 = vsinq.f32 %v859_v56  ;;  %v498_v19 = vsel %vm494_vm7, %v478_v62, %v481_v5  ;;  %v2639_v10 = vsub.s32 %v625_v51, %v628_v12  ;;  %v493_v16 = vor.u32 %v492_v7, %v491_v2 }
  0xdf   : > { %v751_v14 = vmul.f32 %v750_v4, %v748_v41  ;;  %vm496_vm9 = vcmp.lt.s32.totalorder %v2593_v18, 3  ;;  %v499_v22 = vsel %vm497_vm8, %v487_v8, 2102212464  ;;  %v1284_v24 = vand.u32 3, %v1283_v27 }
  0xe0   : > { %vm495_vm10 = vcmp.lt.s32.totalorder %v2593_v18, 2  ;;  %v500_v13 = vsel %vm496_vm9, %v484_v21, %v499_v22  ;;  %vm2649_vm11 = vcmp.le.f32.partialorder %v668_v48, 0.7853982  ;;  %vm670_vm12 = vcmp.lt.s32.totalorder %v2366_v31, 0 }
  0xe1   : > { %v752_v26 = vxor.u32 2147483648, %v751_v14  ;;  %v631_v23 = vsub.s32 0, %v2639_v10  ;;  %v2657_v29 = vsel %vm495_vm10, %v498_v19, %v500_v13  ;;  %vm865_vm13 = vcmp.lt.s32.totalorder %v2600_v63, 2 }
  0xe2   : > { %vm866_vm14 = vcmp.eq.s32.totalorder %v2600_v63, 0  ;;  %v755_v39 = vsel %vm670_vm12, %v754_v44, %v2513_v17  ;;  %v470_v35 = vor.u32 8388608, %v469_v60  ;;  %vm863_vm15 = vweird.f32 %v2368_v32 }
  0xe3   : > { %v753_v27 = vsel %vm670_vm12, %v752_v26, %v751_v14  ;;  %v1991_v36 = vmin.u32 %v631_v23, %v2639_v10  ;;  %v503_v50 = vsel %vm497_vm8, %v490_v59, 920167782  ;;  %v507_v37 = vsel %vm497_vm8, %v493_v16, 1326507024 }
  0xe4   : > { %v756_v48 = vsel %vm2649_vm11, %v2366_v31, %v753_v27  ;;  %vm1285_vm0 = vcmp.lt.s32.totalorder %v1284_v24, 2  ;;  %vm869_vm1 = vcmp.eq.s32.totalorder %v2600_v63, 2  ;;  %v506_v17 = vsel %vm494_vm7, %v484_v21, %v487_v8 }
  0xe5   : > { %2116 = vcosq.f32 %v756_v48  ;;  %vm1286_vm2 = vcmp.eq.s32.totalorder %v1284_v24, 0  ;;  %v757_v44 = vsel %vm2649_vm11, 0, %v755_v39  ;;  %v633_v45 = vclz %v1991_v36 }
  0xe6   : > { %2118 = vsinq.f32 %v756_v48  ;;  %v502_v28 = vsel %vm494_vm7, %v481_v5, %v484_v21  ;;  %v504_v55 = vsel %vm496_vm9, %v487_v8, %v503_v50  ;;  %v508_v40 = vsel %vm496_vm9, %v490_v59, %v507_v37 }
  0xe7   : > { %v510_v42 = vshll.u32 %v470_v35, 8  ;;  %v1992_v49 = vadd.s32 4294967294, %v633_v45  ;;  %v509_v51 = vsel %vm495_vm10, %v506_v17, %v508_v40  ;;  %vm1289_vm3 = vcmp.eq.s32.totalorder %v1284_v24, 2 }
  0xe8   : > { %v2246_v57 = vmov 0.0   ;;  %v1179_v61 = vadd.s32 3, %v757_v44  ;;  %v505_v62 = vsel %vm495_vm10, %v502_v28, %v504_v55  ;;  %v621_v8 = vadd.s32 %v2588_v20, %v2583_v15 }
  0xe9   : > { %v2684_v53 = vmul.u32.u64.low %v510_v42, %v509_v51  ;;  %v2685_v56 = vmul.u32.u64.high %v510_v42, %v509_v51, %v2684_v53  ;;  %1371 = vmatprep.mubr.f32.mxu0 %v2246_v57  ;;  %1472 = vmatprep.mubr.f32.mxu1 %v2246_v57  ;;  %vm1993_vm4 = vcmp.lt.s32.totalorder %v1992_v49, 0  ;;  %v761_v11 = vand.u32 3, %v757_v44 }
  0xea   : > { %v2113_v30 = vpop.eup %2112  ;;  %v636_v3 = vsel %vm1993_vm4, 0, %v1992_v49  ;;  %v2706_v60 = vmul.u32.u64.low %v510_v42, %v505_v62  ;;  %v2707_v63 = vmul.u32.u64.high %v510_v42, %v505_v62, %v2706_v60  ;;  %v1180_v2 = vand.u32 3, %v1179_v61 }
  0xeb   : > { %v2115_v0 = vpop.eup %2114  ;;  %v870_v46 = vxor.u32 2147483648, %v2113_v30  ;;  %v637_v9 = vsub.s32 32, %v636_v3  ;;  %v641_v7 = vsub.s32 4294967266, %v636_v3  ;;  %v638_v18 = vshll.u32 %v2639_v10, %v636_v3 }
  0xec   : > { %v867_v52 = vxor.u32 2147483648, %v2115_v0  ;;  %v518_v20 = vadd.s32 %v2706_v60, %v2685_v56  ;;  %vm519_vm5 = vc.u32 %v2685_v56, %v2706_v60  ;;  %vm760_vm6 = vweird.f32 %v2366_v31 }
  0xed   : > { %v1291_v58 = vsel %vm1289_vm3, %v870_v46, %v2115_v0  ;;  %v871_v38 = vsel %vm869_vm1, %v870_v46, %v2115_v0  ;;  %v639_v12 = vshrl.u32 %v621_v8, %v637_v9  ;;  %v642_v14 = vadd.s32 127, %v641_v7 }
  0xee   : > { %v1288_v1 = vsel %vm1286_vm2, %v2113_v30, %v867_v52  ;;  %v868_v43 = vsel %vm866_vm14, %v2113_v30, %v867_v52  ;;  %vm763_vm7 = vcmp.eq.s32.totalorder %v761_v11, 0  ;;  %vm766_vm8 = vcmp.eq.s32.totalorder %v761_v11, 2 }
  0xef   : > { %v1292_v5 = vsel %vm1285_vm0, %v1288_v1, %v1291_v58  ;;  %v872_v21 = vsel %vm865_vm13, %v868_v43, %v871_v38  ;;  %v640_v15 = vor.u32 %v639_v12, %v638_v18  ;;  %v643_v59 = vshll.u32 %v642_v14, 23 }
  0xf0   : > { %v1293_v41 = vsel %vm863_vm15, nan, %v1292_v5  ;;  %v873_v4 = vsel %vm863_vm15, nan, %v872_v21  ;;  %v520_v19 = vadd.s32 1, %v2707_v63  ;;  %vm1182_vm9 = vcmp.eq.s32.totalorder %v1180_v2, 0 }
  0xf1   : > { %1335 = vmatprep.subr.mxu0 %v1293_v41  ;;  %1436 = vmatprep.subr.mxu1 %v873_v4  ;;  %v644_v22 = vor.u32 4788187, %v643_v59  ;;  %v517_v24 = vmul.u32 %v510_v42, %v2657_v29  ;;  %vm1185_vm10 = vcmp.eq.s32.totalorder %v1180_v2, 2  ;;  %v647_v13 = vcvt.s32.f32 %v640_v15 }
  0xf2   : > { %v2117_v32 = vpop.eup %2116  ;;  %v521_v25 = vsel %vm519_vm5, %v520_v19, %v2707_v63  ;;  %vm1181_vm11 = vcmp.lt.s32.totalorder %v1180_v2, 2  ;;  %vm762_vm12 = vcmp.lt.s32.totalorder %v761_v11, 2  ;;  %vm567_vm13 = vcmp.lt.s32.totalorder %v2372_v34, 0 }
  0xf3   : > { %v2119_v10 = vpop.eup %2118  ;;  %v767_v16 = vxor.u32 2147483648, %v2117_v32  ;;  %v645_v39 = vand.u32 2147483647, %v644_v22  ;;  %v522_v35 = vadd.s32 %v521_v25, %v517_v24  ;;  %v651_v55 = vsub.s32 4, %v2624_v6 }
  0xf4   : > { %v764_v26 = vxor.u32 2147483648, %v2119_v10  ;;  %vm566_vm14 = vcmp.le.f32.partialorder %v565_v47, 0.7853982 }
  0xf5   : > { %v1187_v23 = vsel %vm1185_vm10, %v767_v16, %v2119_v10  ;;  %v768_v27 = vsel %vm766_vm8, %v767_v16, %v2119_v10  ;;  %v648_v17 = vmul.f32 %v647_v13, %v645_v39  ;;  %v523_v44 = vadd.s32 536870912, %v522_v35 }
  0xf6   : > { %v1184_v48 = vsel %vm1182_vm9, %v2117_v32, %v764_v26  ;;  %v765_v36 = vsel %vm763_vm7, %v2117_v32, %v764_v26  ;;  %v652_v31 = vsel %vm567_vm13, %v651_v55, %v2624_v6  ;;  %vm464_vm7 = vcmp.lt.s32.totalorder %v2370_v33, 0  ;;  %v876_v55 = vld [vmem:[%s2853_s3 + $0x10] sm:$0xff] }
  0xf7   : > { %v1188_v50 = vsel %vm1181_vm11, %v1184_v48, %v1187_v23  ;;  %v769_v37 = vsel %vm762_vm12, %v765_v36, %v768_v27  ;;  %v649_v30 = vxor.u32 2147483648, %v648_v17  ;;  %v524_v28 = vshrl.u32 %v523_v44, 30  ;;  %v874_v44 = vld [vmem:[%s2853_s3] sm:$0xff] }
  0xf8   : > { %v1189_v29 = vsel %vm760_vm6, nan, %v1188_v50  ;;  %v770_v45 = vsel %vm760_vm6, nan, %v769_v37  ;;  %v654_v51 = vsel %vm566_vm14, 0, %v652_v31  ;;  %vm657_vm6 = vweird.f32 %v2372_v34 }
  0xf9   : > { %1336 = vmatpush1.msra.mxu0 %v1189_v29  ;;  %1437 = vmatpush1.msra.mxu1 %v770_v45  ;;  %v650_v40 = vsel %vm567_vm13, %v649_v30, %v648_v17  ;;  %v525_v42 = vshll.u32 %v524_v28, 30  ;;  %v1075_v56 = vadd.s32 3, %v654_v51  ;;  %v658_v38 = vand.u32 3, %v654_v51  ;;  %v458_v29 = vld [vmem:[%s2852_s2] sm:$0xff] }
  0xfa   : > { %v653_v0 = vsel %vm566_vm14, %v2372_v34, %v650_v40  ;;  %v548_v10 = vsub.s32 4, %v524_v28  ;;  %vm463_vm8 = vcmp.le.f32.partialorder %v462_v54, 0.7853982  ;;  %v460_v40 = vld [vmem:[%s2852_s2 + $0x10] sm:$0xff] }
  0xfb   : > { %2120 = vcosq.f32 %v653_v0  ;;  %v526_v46 = vsub.s32 %v522_v35, %v525_v42  ;;  %v1076_v61 = vand.u32 3, %v1075_v56  ;;  %vm660_vm0 = vcmp.eq.s32.totalorder %v658_v38, 0  ;;  %v877_v42 = vld [vmem:[%s2853_s3 + $0x18] sm:$0xff] }
  0xfc   : > { %2122 = vsinq.f32 %v653_v0  ;;  %vm663_vm3 = vcmp.eq.s32.totalorder %v658_v38, 2  ;;  %vm659_vm5 = vcmp.lt.s32.totalorder %v658_v38, 2  ;;  %v549_v22 = vsel %vm464_vm7, %v548_v10, %v524_v28  ;;  %v459_v28 = vld [vmem:[%s2852_s2 + $0x8] sm:$0xff]  ;;  %v461_v0 = vld [vmem:[%s2852_s2 + $0x18] sm:$0xff] }
  0xfd   : > { %v528_v49 = vsub.s32 0, %v526_v46  ;;  %vm1078_vm1 = vcmp.eq.s32.totalorder %v1076_v61, 0  ;;  %vm1081_vm2 = vcmp.eq.s32.totalorder %v1076_v61, 2  ;;  %vm1077_vm4 = vcmp.lt.s32.totalorder %v1076_v61, 2 }
  0xfe   : > { %v551_v24 = vsel %vm463_vm8, 0, %v549_v22 }
  0xff   : > { %v1987_v52 = vmin.u32 %v528_v49, %v526_v46  ;;  %v971_v26 = vadd.s32 3, %v551_v24  ;;  %v555_v25 = vand.u32 3, %v551_v24 }
 0x101   : > { %v530_v53 = vclz %v1987_v52  ;;  %v972_v13 = vand.u32 3, %v971_v26  ;;  %vm560_vm10 = vcmp.eq.s32.totalorder %v555_v25, 2  ;;  %vm557_vm12 = vcmp.eq.s32.totalorder %v555_v25, 0 }
 0x102   : > { %vm556_vm14 = vcmp.lt.s32.totalorder %v555_v25, 2 }
 0x103   : > { %v1988_v58 = vadd.s32 4294967294, %v530_v53  ;;  %vm977_vm9 = vcmp.eq.s32.totalorder %v972_v13, 2  ;;  %vm974_vm11 = vcmp.eq.s32.totalorder %v972_v13, 0  ;;  %vm973_vm13 = vcmp.lt.s32.totalorder %v972_v13, 2 }
 0x105   : > { %vm1989_vm15 = vcmp.lt.s32.totalorder %v1988_v58, 0 }
 0x106   : > { %v533_v1 = vsel %vm1989_vm15, 0, %v1988_v58  ;;  %vm554_vm15 = vweird.f32 %v2370_v33 }
 0x107   : > { %v534_v47 = vsub.s32 32, %v533_v1  ;;  %v538_v43 = vsub.s32 4294967266, %v533_v1  ;;  %v535_v21 = vshll.u32 %v526_v46, %v533_v1 }
 0x108   : > { %v2121_v3 = vpop.eup %2120 }
 0x109   : > { %v2123_v62 = vpop.eup %2122  ;;  %v664_v5 = vxor.u32 2147483648, %v2121_v3  ;;  %v536_v8 = vshrl.u32 %v518_v20, %v534_v47  ;;  %v539_v6 = vadd.s32 127, %v538_v43 }
 0x10a   : > { %v661_v9 = vxor.u32 2147483648, %v2123_v62 }
 0x10b   : > { %v1083_v41 = vsel %vm1081_vm2, %v664_v5, %v2123_v62  ;;  %v665_v4 = vsel %vm663_vm3, %v664_v5, %v2123_v62  ;;  %v537_v11 = vor.u32 %v536_v8, %v535_v21  ;;  %v540_v7 = vshll.u32 %v539_v6, 23 }
 0x10c   : > { %v1080_v18 = vsel %vm1078_vm1, %v2121_v3, %v661_v9  ;;  %v662_v12 = vsel %vm660_vm0, %v2121_v3, %v661_v9  ;;  %vm1294_vm0 = vcmask 130048   ;;  %vm1565_vm1 = vcmask 261120  }
 0x10d   : > { %v1084_v60 = vsel %vm1077_vm4, %v1080_v18, %v1083_v41  ;;  %v666_v63 = vsel %vm659_vm5, %v662_v12, %v665_v4  ;;  %v541_v2 = vor.u32 4788187, %v540_v7  ;;  %v544_v59 = vcvt.s32.f32 %v537_v11 }
 0x10e   : > { %v1085_v14 = vsel %vm657_vm6, nan, %v1084_v60  ;;  %v667_v15 = vsel %vm657_vm6, nan, %v666_v63 }
 0x10f   : > { %1337 = vmatprep.subr.mxu0 %v1085_v14  ;;  %1438 = vmatprep.subr.mxu1 %v667_v15  ;;  %v542_v20 = vand.u32 2147483647, %v541_v2 }
 0x111   : > { %v545_v32 = vmul.f32 %v544_v59, %v542_v20 }
 0x113   : > { %v546_v19 = vxor.u32 2147483648, %v545_v32 }
 0x115   : > { %v547_v16 = vsel %vm464_vm7, %v546_v19, %v545_v32 }
 0x116   : > { %v550_v34 = vsel %vm463_vm8, %v2370_v33, %v547_v16  ;;  %v875_v33 = vld [vmem:[%s2853_s3 + $0x8] sm:$0xff] }
 0x117   : > { %2124 = vcosq.f32 %v550_v34 }
 0x118   : > { %2126 = vsinq.f32 %v550_v34 }
 0x124   : > { %v2125_v23 = vpop.eup %2124 }
 0x125   : > { %v2127_v27 = vpop.eup %2126  ;;  %v561_v39 = vxor.u32 2147483648, %v2125_v23 }
 0x126   : > { %v558_v35 = vxor.u32 2147483648, %v2127_v27 }
 0x127   : > { %v979_v48 = vsel %vm977_vm9, %v561_v39, %v2127_v27  ;;  %v562_v54 = vsel %vm560_vm10, %v561_v39, %v2127_v27  ;;  %v1538_v39 = vld [vmem:[%s2855_s5 + $0x8] sm:$0xff] }
 0x128   : > { %v976_v36 = vsel %vm974_vm11, %v2125_v23, %v558_v35  ;;  %v559_v50 = vsel %vm557_vm12, %v2125_v23, %v558_v35  ;;  %v1537_v23 = vld [vmem:[%s2855_s5] sm:$0xff]  ;;  %v1539_v35 = vld [vmem:[%s2855_s5 + $0x10] sm:$0xff] }
 0x129   : > { %v980_v37 = vsel %vm973_vm13, %v976_v36, %v979_v48  ;;  %v563_v17 = vsel %vm556_vm14, %v559_v50, %v562_v54  ;;  %v1540_v48 = vld [vmem:[%s2855_s5 + $0x18] sm:$0xff] }
 0x12a   : > { %v981_v45 = vsel %vm554_vm15, nan, %v980_v37  ;;  %v564_v30 = vsel %vm554_vm15, nan, %v563_v17 }
 0x12b   : > { %1338 = vmatpush1.msra.mxu0 %v981_v45  ;;  %1439 = vmatpush1.msra.mxu1 %v564_v30 }
 0x12c   : > { %2018 = vmatmul.mubr.msk.f32.vlgmr.msra.gmra.mxu0 %vm1294_vm0, %v874_v44  ;;  %2022 = vmatmul.mubr.msk.f32.vlgmr.msra.gmra.mxu1 %vm1294_vm0, %v458_v29 }
 0x12d   : > { %1377 = vmatprep.mubr.f32.mxu0 %v2246_v57  ;;  %1478 = vmatprep.mubr.f32.mxu1 %v2246_v57 }
 0x12e   : > { %v1514_v7 = vpop.permute.xlu0 %1513 }
 0x130   : > { %2019 = vmatmul.mubr.msk.f32.gmra.mxu0 %vm1294_vm0, %v875_v33  ;;  %2023 = vmatmul.mubr.msk.f32.gmra.mxu1 %vm1294_vm0, %v459_v28 }
 0x131   : > { %1383 = vmatprep.mubr.f32.mxu0 %v2246_v57  ;;  %1484 = vmatprep.mubr.f32.mxu1 %v2246_v57 }
 0x134   : > { %2020 = vmatmul.mubr.msk.f32.gmra.mxu0 %vm1294_vm0, %v876_v55  ;;  %2024 = vmatmul.mubr.msk.f32.gmra.mxu1 %vm1294_vm0, %v460_v40  ;;  %v1563_v44 = vpop.permute.xlu0 %1562 }
 0x135   : > { %1389 = vmatprep.mubr.f32.mxu0 %v2246_v57  ;;  %1490 = vmatprep.mubr.f32.mxu1 %v2246_v57 }
 0x136   : > { %v1519_v38 = vpop.permute.xlu1 %1518 }
 0x138   : > { %2021 = vmatmul.mubr.msk.f32.gmra.mxu0 %vm1294_vm0, %v877_v42  ;;  %2025 = vmatmul.mubr.msk.f32.gmra.mxu1 %vm1294_vm0, %v461_v0  ;;  %v1553_v42 = vpop.permute.xlu0 %1552 }
 0x139   : > { %1642 = vmatprep.mubr.f32.mxu0 %v2246_v57  ;;  %1779 = vmatprep.mubr.f32.mxu1 %v2246_v57 }
 0x13a   : > { %v1509_v5 = vpop.permute.xlu1 %1508 }
 0x13e   : > { %v1504_v59 = vpop.permute.xlu1 %1503 }
 0x142   : > { %v1558_v45 = vpop.permute.xlu1 %1557 }
 0x1ec   : > { %v1373_v46 = vpop.f32.mrf.mxu0  ;;  %v1474_v31 = vpop.f32.mrf.mxu1 }
 0x1ed   : > { %v1475_v14 = vadd.f32 %v1474_v31, %v1373_v46  ;;  %v1548_v31 = vpop.permute.xlu1 %1547 }
 0x1ee   : > { %v1375_v49 = vpop.f32.mrf.mxu0  ;;  %v1476_v51 = vpop.f32.mrf.mxu1 }
 0x1ef   : > { %v1477_v60 = vadd.f32 %v1476_v51, %v1375_v49  ;;  %v1521_v10 = vadd.f32 %v1504_v59, %v1475_v14 }
 0x1f0   : > { %v1379_v52 = vpop.f32.mrf.mxu0  ;;  %v1480_v53 = vpop.f32.mrf.mxu1 }
 0x1f1   : > { %v1481_v18 = vadd.f32 %v1480_v53, %v1379_v52  ;;  %v1522_v19 = vadd.f32 %v1504_v59, %v1477_v60 }
 0x1f2   : > { %v1381_v56 = vpop.f32.mrf.mxu0  ;;  %v1482_v58 = vpop.f32.mrf.mxu1 }
 0x1f3   : > { %v1483_v4 = vadd.f32 %v1482_v58, %v1381_v56  ;;  %v1523_v32 = vadd.f32 %v1509_v5, %v1481_v18  ;;  %v1696_v18 = vpop.permute.xlu1 %1695 }
 0x1f4   : > { %v1385_v61 = vpop.f32.mrf.mxu0  ;;  %v1486_v1 = vpop.f32.mrf.mxu1 }
 0x1f5   : > { %v1487_v6 = vadd.f32 %v1486_v1, %v1385_v61  ;;  %v1524_v20 = vadd.f32 %v1509_v5, %v1483_v4  ;;  %v1677_v5 = vld [vmem:[%s2857_s7 + $0x10] sm:$0xff] }
 0x1f6   : > { %v1387_v47 = vpop.f32.mrf.mxu0  ;;  %v1488_v43 = vpop.f32.mrf.mxu1 }
 0x1f7   : > { %v1489_v21 = vadd.f32 %v1488_v43, %v1387_v47  ;;  %v1525_v15 = vadd.f32 %v1514_v7, %v1487_v6  ;;  %v1675_v43 = vld [vmem:[%s2857_s7] sm:$0xff]  ;;  %v1686_v59 = vpop.permute.xlu1 %1685 }
 0x1f8   : > { %v1391_v3 = vpop.f32.mrf.mxu0  ;;  %v1492_v62 = vpop.f32.mrf.mxu1 }
 0x1f9   : > { %v1493_v8 = vadd.f32 %v1492_v62, %v1391_v3  ;;  %v1526_v63 = vadd.f32 %v1514_v7, %v1489_v21  ;;  %v1676_v62 = vld [vmem:[%s2857_s7 + $0x8] sm:$0xff]  ;;  %v1678_v21 = vld [vmem:[%s2857_s7 + $0x18] sm:$0xff] }
 0x1fa   : > { %v1393_v9 = vpop.f32.mrf.mxu0  ;;  %v1494_v41 = vpop.f32.mrf.mxu1 }
 0x1fb   : > { %v1495_v11 = vadd.f32 %v1494_v41, %v1393_v9  ;;  %v1527_v12 = vadd.f32 %v1519_v38, %v1493_v8 }
 0x1fd   : > { %v1528_v2 = vadd.f32 %v1519_v38, %v1495_v11  ;;  %v1701_v11 = vpop.permute.xlu0 %1700 }
 0x1ff   : > { %2128 = vtanh.f32 %v1528_v2 }
 0x200   : > { %2130 = vtanh.f32 %v1527_v12 }
 0x201   : > { %2132 = vtanh.f32 %v1526_v63 }
 0x202   : > { %2134 = vtanh.f32 %v1525_v15 }
 0x203   : > { %2136 = vtanh.f32 %v1524_v20 }
 0x204   : > { %2138 = vtanh.f32 %v1523_v32 }
 0x205   : > { %2140 = vtanh.f32 %v1522_v19 }
 0x206   : > { %2142 = vtanh.f32 %v1521_v10 }
 0x20c   : > { %v2129_v16 = vpop.eup %2128 }
 0x20d   : > { %v2131_v34 = vpop.eup %2130  ;;  %1602 = vmatprep.subr.mxu0 %v2129_v16 }
 0x20e   : > { %v2133_v22 = vpop.eup %2132  ;;  %1603 = vmatpush1.msra.mxu0 %v2131_v34 }
 0x20f   : > { %v2135_v24 = vpop.eup %2134  ;;  %1604 = vmatprep.subr.mxu0 %v2133_v22 }
 0x210   : > { %v2137_v26 = vpop.eup %2136  ;;  %1605 = vmatpush1.msra.mxu0 %v2135_v24 }
 0x211   : > { %v2139_v13 = vpop.eup %2138  ;;  %1606 = vmatprep.subr.mxu0 %v2137_v26 }
 0x212   : > { %v2141_v25 = vpop.eup %2140  ;;  %1607 = vmatpush1.msra.mxu0 %v2139_v13 }
 0x213   : > { %v2143_v27 = vpop.eup %2142  ;;  %1608 = vmatprep.subr.mxu0 %v2141_v25 }
 0x214   : > { %1609 = vmatpush1.msra.mxu0 %v2143_v27 }
 0x215   : > { %2026 = vmatmul.mubr.msk.f32.vlgmr.msra.gmra.mxu0 %vm1565_vm1, %v1537_v23  ;;  %v1812_v23 = vld [vmem:[%s2859_s9] sm:$0x3] }
 0x216   : > { %1648 = vmatprep.mubr.f32.mxu0 %v2246_v57 }
 0x219   : > { %2027 = vmatmul.mubr.msk.f32.gmra.mxu0 %vm1565_vm1, %v1538_v39 }
 0x21a   : > { %1654 = vmatprep.mubr.f32.mxu0 %v2246_v57 }
 0x21d   : > { %2028 = vmatmul.mubr.msk.f32.gmra.mxu0 %vm1565_vm1, %v1539_v35 }
 0x21e   : > { %1660 = vmatprep.mubr.f32.mxu0 %v2246_v57 }
 0x221   : > { %2029 = vmatmul.mubr.msk.f32.gmra.mxu0 %vm1565_vm1, %v1540_v48 }
 0x222   : > { %1886 = vmatprep.mubr.f32.mxu0 %v2246_v57 }
 0x2d5   : > { %v1644_v54 = vpop.f32.mrf.mxu0 }
 0x2d6   : > { %v1645_v52 = vadd.f32 %v1644_v54, %v1548_v31 }
 0x2d7   : > { %v1646_v36 = vpop.f32.mrf.mxu0 }
 0x2d8   : > { %v1647_v51 = vadd.f32 %v1646_v36, %v1548_v31 }
 0x2d9   : > { %v1650_v50 = vpop.f32.mrf.mxu0 }
 0x2da   : > { %v1651_v49 = vadd.f32 %v1650_v50, %v1553_v42 }
 0x2db   : > { %v1652_v37 = vpop.f32.mrf.mxu0 }
 0x2dc   : > { %v1653_v46 = vadd.f32 %v1652_v37, %v1553_v42 }
 0x2dd   : > { %v1656_v17 = vpop.f32.mrf.mxu0 }
 0x2de   : > { %v1657_v0 = vadd.f32 %v1656_v17, %v1558_v45 }
 0x2df   : > { %v1658_v29 = vpop.f32.mrf.mxu0 }
 0x2e0   : > { %v1659_v55 = vadd.f32 %v1658_v29, %v1558_v45 }
 0x2e1   : > { %v1662_v30 = vpop.f32.mrf.mxu0 }
 0x2e2   : > { %v1663_v33 = vadd.f32 %v1662_v30, %v1563_v44 }
 0x2e3   : > { %v1664_v28 = vpop.f32.mrf.mxu0 }
 0x2e4   : > { %v1665_v40 = vadd.f32 %v1664_v28, %v1563_v44 }
 0x2e6   : > { %2144 = vtanh.f32 %v1665_v40 }
 0x2e7   : > { %2146 = vtanh.f32 %v1663_v33 }
 0x2e8   : > { %2148 = vtanh.f32 %v1659_v55 }
 0x2e9   : > { %2150 = vtanh.f32 %v1657_v0 }
 0x2ea   : > { %2152 = vtanh.f32 %v1653_v46 }
 0x2eb   : > { %2154 = vtanh.f32 %v1651_v49 }
 0x2ec   : > { %2156 = vtanh.f32 %v1647_v51 }
 0x2ed   : > { %2158 = vtanh.f32 %v1645_v52 }
 0x2f3   : > { %v2145_v53 = vpop.eup %2144 }
 0x2f4   : > { %v2147_v56 = vpop.eup %2146  ;;  %1739 = vmatprep.subr.mxu1 %v2145_v53 }
 0x2f5   : > { %v2149_v58 = vpop.eup %2148  ;;  %1740 = vmatpush1.msra.mxu1 %v2147_v56 }
 0x2f6   : > { %v2151_v38 = vpop.eup %2150  ;;  %1741 = vmatprep.subr.mxu1 %v2149_v58 }
 0x2f7   : > { %v2153_v61 = vpop.eup %2152  ;;  %1742 = vmatpush1.msra.mxu1 %v2151_v38 }
 0x2f8   : > { %v2155_v1 = vpop.eup %2154  ;;  %1743 = vmatprep.subr.mxu1 %v2153_v61 }
 0x2f9   : > { %v2157_v47 = vpop.eup %2156  ;;  %1744 = vmatpush1.msra.mxu1 %v2155_v1 }
 0x2fa   : > { %v2159_v3 = vpop.eup %2158  ;;  %1745 = vmatprep.subr.mxu1 %v2157_v47 }
 0x2fb   : > { %1746 = vmatpush1.msra.mxu1 %v2159_v3 }
 0x2fc   : > { %2030 = vmatmul.mubr.msk.f32.vlgmr.msra.gmra.mxu1 %vm1565_vm1, %v1675_v43 }
 0x2fd   : > { %1785 = vmatprep.mubr.f32.mxu1 %v2246_v57 }
 0x300   : > { %2031 = vmatmul.mubr.msk.f32.gmra.mxu1 %vm1565_vm1, %v1676_v62 }
 0x301   : > { %1791 = vmatprep.mubr.f32.mxu1 %v2246_v57 }
 0x304   : > { %2032 = vmatmul.mubr.msk.f32.gmra.mxu1 %vm1565_vm1, %v1677_v5 }
 0x305   : > { %1797 = vmatprep.mubr.f32.mxu1 %v2246_v57  ;;  %v1691_v57 = vpop.permute.xlu0 %1690 }
 0x308   : > { %2033 = vmatmul.mubr.msk.f32.gmra.mxu1 %vm1565_vm1, %v1678_v21 }
 0x309   : > { %v1817_v35 = vpop.permute.xlu0 %1816 }
 0x3bc   : > { %v1781_v8 = vpop.f32.mrf.mxu1 }
 0x3bd   : > { %v1782_v10 = vadd.f32 %v1781_v8, %v1686_v59 }
 0x3be   : > { %v1783_v6 = vpop.f32.mrf.mxu1 }
 0x3bf   : > { %v1784_v19 = vadd.f32 %v1783_v6, %v1686_v59 }
 0x3c0   : > { %v1787_v9 = vpop.f32.mrf.mxu1 }
 0x3c1   : > { %v1788_v32 = vadd.f32 %v1787_v9, %v1691_v57 }
 0x3c2   : > { %v1789_v41 = vpop.f32.mrf.mxu1 }
 0x3c3   : > { %v1790_v20 = vadd.f32 %v1789_v41, %v1691_v57 }
 0x3c4   : > { %v1793_v4 = vpop.f32.mrf.mxu1 }
 0x3c5   : > { %v1794_v15 = vadd.f32 %v1793_v4, %v1696_v18 }
 0x3c6   : > { %v1795_v7 = vpop.f32.mrf.mxu1 }
 0x3c7   : > { %v1796_v2 = vadd.f32 %v1795_v7, %v1696_v18 }
 0x3c8   : > { %v1799_v12 = vpop.f32.mrf.mxu1 }
 0x3c9   : > { %v1800_v60 = vadd.f32 %v1799_v12, %v1701_v11 }
 0x3ca   : > { %v1801_v63 = vpop.f32.mrf.mxu1 }
 0x3cb   : > { %v1802_v14 = vadd.f32 %v1801_v63, %v1701_v11 }
 0x3cd   : > { %2160 = vtanh.f32 %v1802_v14 }
 0x3ce   : > { %2162 = vtanh.f32 %v1800_v60 }
 0x3cf   : > { %2164 = vtanh.f32 %v1796_v2 }
 0x3d0   : > { %2166 = vtanh.f32 %v1794_v15 }
 0x3d1   : > { %2168 = vtanh.f32 %v1790_v20 }
 0x3d2   : > { %2170 = vtanh.f32 %v1788_v32 }
 0x3d3   : > { %2172 = vtanh.f32 %v1784_v19 }
 0x3d4   : > { %2174 = vtanh.f32 %v1782_v10 }
 0x3da   : > { %v2161_v16 = vpop.eup %2160 }
 0x3db   : > { %v2163_v34 = vpop.eup %2162  ;;  %1846 = vmatprep.subr.mxu0 %v2161_v16 }
 0x3dc   : > { %v2165_v22 = vpop.eup %2164  ;;  %1847 = vmatpush1.msra.mxu0 %v2163_v34 }
 0x3dd   : > { %v2167_v24 = vpop.eup %2166  ;;  %1848 = vmatprep.subr.mxu0 %v2165_v22 }
 0x3de   : > { %v2169_v26 = vpop.eup %2168  ;;  %1849 = vmatpush1.msra.mxu0 %v2167_v24 }
 0x3df   : > { %v2171_v13 = vpop.eup %2170  ;;  %1850 = vmatprep.subr.mxu0 %v2169_v26 }
 0x3e0   : > { %v2173_v25 = vpop.eup %2172  ;;  %1851 = vmatpush1.msra.mxu0 %v2171_v13 }
 0x3e1   : > { %v2175_v27 = vpop.eup %2174  ;;  %1852 = vmatprep.subr.mxu0 %v2173_v25 }
 0x3e2   : > { %1853 = vmatpush1.msra.mxu0 %v2175_v27 }
 0x3e3   : > { %2034 = vmatmul.mubr.msk.f32.vlgmr.msra.gmra.mxu0 %vm1565_vm1, %v1812_v23 }
 0x4a3   : > { %v1888_v39 = vpop.f32.mrf.mxu0 }
 0x4a4   : > { %v1889_v54 = vadd.f32 %v1888_v39, %v1817_v35 }
 0x4a5   : > { %v1890_v48 = vpop.f32.mrf.mxu0 }
 0x4a6   : > { %v1891_v36 = vadd.f32 %v1890_v48, %v1817_v35 }
 0x4a8   : > { %v1895_v50 = vcombine.low %v1889_v54, %v1891_v36 }
 0x4aa   : > { %2035 = vst.sshfl [vmem:[%s380_s12] sm:$0x33 pattern:$0x76325410] %v1895_v50 }
 0x4ab   : > { %2189 = shalt.err (!%p2186_p3)
}
 0x4ac   : > { %s2190_s29 = scalar_lea.hbm %s1918_s16, 64  ;;  %s2194_s12 = scalar_lea.hbm %s2861_s11, 512 }
 0x4ad   : > { %p2191_p4 = scmp.ne.s32.totalorder %s1918_s16, %s2190_s29  ;;  %p2195_p9 = scmp.lt.s32.totalorder %s1918_s16, %s2861_s11 }
 0x4ae   : > { %p2196_p10 = scmp.lt.s32.totalorder %s2194_s12, %s2190_s29 }
 0x4af   : > { %p2192_p7 = pnand %p2191_p4, %p2346_p5 }
 0x4b0   : > { %p2197_p11 = por %p2196_p10, %p2195_p9 }
 0x4b1   : > { %p2193_p8 = pneg %p2192_p7 }
 0x4b3   : > { %p2198_p12 = pnand %p2197_p11, %p2193_p8 }
 0x4b5   : > { %2201 = shalt.err (!%p2198_p12)
}
 0x4b6   : > { %2058 = dma.vmem_to_hbm [thread:$0]  (%p2346_p5), %s1921_s13, 64, %s1918_s16, %s1906_s22  }
 0x4b7 PF: > { %p2064_p13 = scmp.ge.s32.totalorder %s2236_s20, 2  ;;  %s1932_s0 = sand.u32 1, %s2224_s17  }
 0x4b8   : > { %s1933_s1 = scalar_lea.sflag [#allocation3], %s1932_s0 }
 0x4b9   : > { %p2061_p0 = pnand %p2064_p13, %p2350_p6 }
 0x4bb   : > { %p2062_p1 = pneg %p2061_p0 }
 0x4bd   : > { %2219 = dma.done.wait (%p2062_p1), %s1933_s1, 64  }
 0x4be   : > { %2221 = vsyncadd (%p2062_p1), %s1933_s1, 4294967232  ;;  %p21_p2 = scmp.ge.s32.totalorder %s2333_s23, 10   ;;  %s2872_s17 = smov %s2228_s18 }
 0x4bf   : > { %s2873_s18 = smov %s2232_s19  ;;  %s2874_s19 = smov %s2344_s26 }
 0x4c0   : > { %s2875_s20 = smov %s2333_s23  ;;  %23 = sbr.rel (!%p21_p2) target bundleno = 6 (0x6), region = 99 }
 0x4c5   :  { %1938 = vsyncpa [#allocation3], 1 }
 0x4c6   :  { %1940 = vsyncpa [#allocation3 + $0x1], 1 }

// kernel: tpu_custom_call.1
= control target key start
LH: loop header
LB: loop body
LE: loop exit
PB: predicated region body
PF: predicated region fallthrough
CT: control target
= control target key end

     0   :  { %s2850_s0 = inlined_call_operand.vmem [shape: f32[2,2048], index: 0, kind: input, shape index: {}]   ;;  %s2851_s1 = inlined_call_operand.vmem [shape: f32[16,2], index: 1, kind: input, shape index: {}]   ;;  %s2852_s2 = inlined_call_operand.vmem [shape: f32[32,16], index: 2, kind: input, shape index: {}]   ;;  %s2853_s3 = inlined_call_operand.vmem [shape: f32[32,16], index: 3, kind: input, shape index: {}]   ;;  %s2854_s4 = inlined_call_operand.vmem [shape: f32[32,1], index: 4, kind: input, shape index: {}]   ;;  %s2855_s5 = inlined_call_operand.vmem [shape: f32[32,32], index: 5, kind: input, shape index: {}]   ;;  %s2856_s6 = inlined_call_operand.vmem [shape: f32[32,1], index: 6, kind: input, shape index: {}]   ;;  %s2857_s7 = inlined_call_operand.vmem [shape: f32[32,32], index: 7, kind: input, shape index: {}]   ;;  %s2858_s8 = inlined_call_operand.vmem [shape: f32[32,1], index: 8, kind: input, shape index: {}]   ;;  %s2859_s9 = inlined_call_operand.vmem [shape: f32[2,32], index: 9, kind: input, shape index: {}]   ;;  %s2860_s10 = inlined_call_operand.vmem [shape: f32[2,1], index: 10, kind: input, shape index: {}]   ;;  %s2861_s11 = inlined_call_operand.hbm [shape: f32[2,2048], index: 11, kind: output, shape index: {}]  }
   0x1   :  { %2862 = sst [smem:[#allocation5_spill]] %s2850_s0 }
   0x2   :  { %2863 = sst [smem:[#allocation6_spill]] %s2851_s1 }
   0x3   :  { %16 = vsyncpa [#allocation3], 0 }
   0x4   :  { %18 = vsyncpa [#allocation3 + $0x1], 0  ;;  %s2308_s17 = smov 0   ;;  %s2310_s18 = smov 0  }
   0x5   :  { %s2312_s19 = smov 0   ;;  %s2314_s20 = smov 0  }
   0x6 LB: > { %s2329_s21 = sadd.s32 4294967295, %s2236_s20   ;;  %s1979_s22 = sadd.s32 4294967294, %s2236_s20   ;;  %s2236_s20 = sphi %s2314_s20, %s2875_s20   ;;  %s2232_s19 = sphi %s2312_s19, %s2874_s19   ;;  %s2228_s18 = sphi %s2310_s18, %s2873_s18   ;;  %s2224_s17 = sphi %s2308_s17, %s2872_s17  }
   0x7   : > { %s2333_s23 = sadd.s32 1, %s2236_s20   ;;  %s267_s24 = sadd.s32 1, %s2232_s19 }
   0x8   : > { %s264_s25 = ssub.s32 %s2236_s20, %s2333_s23  ;;  %p277_p0 = scmp.ne.s32.totalorder %s2232_s19, %s2228_s18 }
   0x9   : > { %p265_p1 = scmp.eq.s32.totalorder %s264_s25, 0  ;;  %p278_p2 = scmp.eq.s32.totalorder %s2329_s21, 7 }
   0xa   : > { %p283_p3 = scmp.ne.s32.totalorder %s2228_s18, %s2224_s17  ;;  %p284_p4 = scmp.eq.s32.totalorder %s1979_s22, 7 }
   0xb   : > { %s2344_s26 = scalar_select %p265_p1, %s2232_s19, %s267_s24  }
   0xc   : > { %p2346_p5 = por %p278_p2, %p277_p0  ;;  %p2350_p6 = por %p284_p4, %p283_p3 }
   0xd   : > { %p1982_p7 = scmp.ge.s32.totalorder %s2236_s20, 1  ;;  %p341_p8 = scmp.lt.s32.totalorder %s2236_s20, 9 }
   0xf   : > { %p342_p9 = pnand %p1982_p7, %p341_p8 }
  0x10   : > { %s2866_s1 = sld [smem:[#allocation6_spill]] (!%p342_p9)  ;;  %s1984_s14 = sshll.u32 (!%p342_p9), %s2329_s21, 1 }
  0x11   : > { %345 = sbr.rel (%p342_p9) target bundleno = 1207 (0x4b7), region = 64  ;;  %p382_p10 = scmp.lt.s32.totalorder (!%p342_p9), %s1984_s14, 15 }
  0x12   : > { %s2867_s0 = sld [smem:[#allocation5_spill]] (!%p342_p9)  ;;  %s378_s25 = sand.u32 (!%p342_p9), 1, %s2228_s18  }
  0x13   : > { %s1983_s29 = sshll.u32 (!%p342_p9), %s378_s25, 2  ;;  %s2041_s30 = sshll.u32 (!%p342_p9), %s2329_s21, 6 }
  0x14   : > { %s380_s12 = scalar_lea.vmem (!%p342_p9), [#allocation2], %s1983_s29  ;;  %s1918_s16 = scalar_lea.hbm (!%p342_p9), %s2861_s11, %s2041_s30 }
  0x15   : > { %s1920_s13 = sshll.u32 (!%p342_p9), %s380_s12, 4  ;;  %s1906_s22 = scalar_lea.sflag (!%p342_p9), [#allocation3], %s378_s25  ;;  %s1921_s13 = int_to_ptr.vmem [resolvable:$true] %s1920_s13 }
  0x16   : > { %v390_v0 = vld [vmem:[%s2866_s1 + $0x8] sm:$0xff]  ;;  %v389_v1 = vld [vmem:[%s2866_s1] sm:$0xff]  ;;  %v2238_v2 = vmov 0   ;;  %v2239_v3 = vmov 1   ;;  %s2877_s14 = smov (!%p382_p10, %s1984_s14), 15  ;;  %v402_v4 = vlaneseq }
  0x17   : > { %2108 = vset.pattern.permute.xlu1 %v2238_v2  ;;  %2106 = vset.pattern.permute.xlu0 %v2238_v2  ;;  %s1985_s15 = sshll.u32 %s2877_s14, 1 }
  0x18   : > { %398 = vperm.xlu0 %2106, %v390_v0   ;;  %393 = vperm.xlu1 %2108, %v389_v1   ;;  %v403_v5 = vshrl.u32 %v402_v4, 7  ;;  %s385_s24 = scalar_lea.vmem %s2867_s0, %s1985_s15  ;;  %v2241_v4 = vmov 2475754826   ;;  %s2247_s0 = smov [#allocation2]  }
  0x19   : > { %v388_v8 = vld [vmem:[%s385_s24] sm:$0xf]  ;;  %s2176_s24 = scalar_lea.vmem %s1921_s13, 64  ;;  %s2180_s1 = sshll.u32 %s2247_s0, 4  ;;  %s2181_s1 = int_to_ptr.vmem [resolvable:$false] %s2180_s1 }
  0x1a   : > { %v404_v6 = vsub.s32 0, %v403_v5  ;;  %v408_v7 = vsub.s32 2, %v403_v5  ;;  %v434_v9 = vsub.s32 1, %v403_v5  ;;  %v438_v10 = vsub.s32 3, %v403_v5  ;;  %p2177_p11 = scmp.ne.s32.totalorder %s1921_s13, %s2176_s24  ;;  %s2182_s21 = scalar_lea.vmem %s2181_s1, 128 }
  0x1b   : > { %p2183_p0 = scmp.lt.s32.totalorder %s1921_s13, %s2181_s1  ;;  %p2184_p1 = scmp.lt.s32.totalorder %s2182_s21, %s2176_s24 }
  0x1c   : > { %2107 = vset.pattern.permute.xlu0 %v2239_v3  ;;  %2109 = vset.pattern.permute.xlu1 %v2239_v3  ;;  %v405_v11 = vrot.slane %v388_v8, %v404_v6  ;;  %v409_v12 = vrot.slane %v388_v8, %v408_v7  ;;  %v435_v13 = vrot.slane %v388_v8, %v434_v9  ;;  %v2242_v7 = vmov 2131351028   ;;  %p2178_p12 = pnand %p2177_p11, %p2346_p5 }
  0x1d   : > { %429 = vperm.xlu0 %2107, %v390_v0   ;;  %425 = vperm.xlu1 %2109, %v389_v1   ;;  %v439_v14 = vrot.slane %v388_v8, %v438_v10  ;;  %v2243_v10 = vmov 2102212464   ;;  %p2185_p2 = por %p2184_p1, %p2183_p0 }
  0x1e   : > { %v415_v17 = vrot.slane %v405_v11, %v404_v6  ;;  %v419_v18 = vrot.slane %v409_v12, %v404_v6  ;;  %v445_v19 = vrot.slane %v435_v13, %v434_v9  ;;  %v2244_v13 = vmov 920167782   ;;  %p2179_p13 = pneg %p2178_p12 }
  0x1f   : > { %v449_v20 = vrot.slane %v439_v14, %v434_v9 }
  0x20   : > { %p2186_p3 = pnand %p2185_p2, %p2179_p13 }
  0x21   : > { %2110 = vset.pattern.permute.xlu1 %v2238_v2  ;;  %2111 = vset.pattern.permute.xlu0 %v2238_v2  ;;  %v2240_v2 = vmov 683565275  }
  0x93   : > { %v399_v15 = vpop.permute.xlu0 %398  ;;  %v394_v16 = vpop.permute.xlu1 %393 }
  0x94   : > { %v422_v21 = vmul.f32 %v415_v17, %v399_v15  ;;  %v423_v22 = vmul.f32 %v419_v18, %v399_v15  ;;  %v420_v23 = vmul.f32 %v415_v17, %v394_v16  ;;  %v421_v24 = vmul.f32 %v419_v18, %v394_v16 }
  0x95   : > { %v2245_v16 = vmov 1326507024  }
  0x98   : > { %v430_v25 = vpop.permute.xlu0 %429  ;;  %v426_v26 = vpop.permute.xlu1 %425 }
  0x99   : > { %v452_v27 = vmul.f32 %v445_v19, %v430_v25  ;;  %v453_v28 = vmul.f32 %v449_v20, %v430_v25  ;;  %v450_v29 = vmul.f32 %v445_v19, %v426_v26  ;;  %v451_v30 = vmul.f32 %v449_v20, %v426_v26 }
  0x9b   : > { %v2366_v31 = vadd.f32 %v452_v27, %v422_v21  ;;  %v2368_v32 = vadd.f32 %v453_v28, %v423_v22  ;;  %v2370_v33 = vadd.f32 %v450_v29, %v420_v23  ;;  %v2372_v34 = vadd.f32 %v451_v30, %v421_v24 }
  0x9d   : > { %v671_v35 = vand.u32 2139095040, %v2366_v31  ;;  %v774_v36 = vand.u32 2139095040, %v2368_v32  ;;  %v465_v37 = vand.u32 2139095040, %v2370_v33  ;;  %v568_v38 = vand.u32 2139095040, %v2372_v34 }
  0x9e   : > { %v771_v39 = vand.u32 2147483647, %v2368_v32  ;;  %v668_v48 = vand.u32 2147483647, %v2366_v31  ;;  %vm773_vm14 = vcmp.lt.s32.totalorder %v2368_v32, 0 }
  0x9f   : > { %v672_v40 = vshrl.u32 %v671_v35, 23  ;;  %v775_v41 = vshrl.u32 %v774_v36, 23  ;;  %v569_v42 = vshrl.u32 %v568_v38, 23  ;;  %v466_v43 = vshrl.u32 %v465_v37, 23 }
  0xa0   : > { %v778_v44 = vand.u32 8388607, %v771_v39  ;;  %v2384_v54 = vand.u32 8388607, %v668_v48  ;;  %vm2521_vm15 = vcmp.le.f32.partialorder %v771_v39, 0.7853982 }
  0xa1   : > { %v1994_v45 = vadd.s32 4294967169, %v672_v40  ;;  %v1998_v46 = vadd.s32 4294967169, %v775_v41  ;;  %v1990_v47 = vadd.s32 4294967169, %v569_v42  ;;  %v1986_v52 = vadd.s32 4294967169, %v466_v43 }
  0xa2   : > { %v779_v53 = vor.u32 8388608, %v778_v44  ;;  %v676_v63 = vor.u32 8388608, %v2384_v54 }
  0xa3   : > { %v678_v49 = vadd.s32 1, %v1994_v45  ;;  %v781_v50 = vadd.s32 1, %v1998_v46  ;;  %v575_v51 = vadd.s32 1, %v1990_v47  ;;  %v2386_v58 = vadd.s32 1, %v1986_v52 }
  0xa4   : > { %v2388_v59 = vshll.u32 %v779_v53, 8 }
  0xa5   : > { %vm679_vm0 = vcmp.gt.s32.totalorder %v678_v49, 0  ;;  %vm782_vm1 = vcmp.gt.s32.totalorder %v781_v50, 0  ;;  %vm576_vm2 = vcmp.gt.s32.totalorder %v575_v51, 0  ;;  %vm473_vm12 = vcmp.gt.s32.totalorder %v2386_v58, 0 }
  0xa6   : > { %v680_v55 = vsel %vm679_vm0, %v678_v49, 0  ;;  %v783_v56 = vsel %vm782_vm1, %v781_v50, 0  ;;  %v2390_v62 = vsel %vm576_vm2, %v575_v51, 0 }
  0xa7   : > { %v785_v57 = vand.u32 31, %v783_v56  ;;  %v682_v60 = vand.u32 31, %v680_v55  ;;  %v2393_v0 = vshrl.u32 %v680_v55, 5  ;;  %v784_v1 = vshrl.u32 %v783_v56, 5 }
  0xa9   : > { %v786_v61 = vsub.s32 32, %v785_v57  ;;  %v788_v3 = vshll.u32 %v2240_v2, %v785_v57  ;;  %v791_v5 = vshll.u32 %v2241_v4, %v785_v57  ;;  %v794_v9 = vshll.u32 %v2242_v7, %v785_v57 }
  0xaa   : > { %v797_v12 = vshll.u32 %v2243_v10, %v785_v57  ;;  %v800_v15 = vshll.u32 %v2244_v13, %v785_v57  ;;  %v683_v18 = vsub.s32 32, %v682_v60  ;;  %vm803_vm3 = vcmp.lt.s32.totalorder %v784_v1, 1 }
  0xab   : > { %v789_v6 = vshrl.u32 %v2241_v4, %v786_v61  ;;  %v792_v8 = vshrl.u32 %v2242_v7, %v786_v61  ;;  %v795_v11 = vshrl.u32 %v2243_v10, %v786_v61  ;;  %v798_v14 = vshrl.u32 %v2244_v13, %v786_v61 }
  0xac   : > { %v801_v17 = vshrl.u32 %v2245_v16, %v786_v61  ;;  %vm806_vm4 = vcmp.lt.s32.totalorder %v784_v1, 4  ;;  %v787_v24 = vshrl.u32 %v2240_v2, %v786_v61  ;;  %vm804_vm5 = vcmp.lt.s32.totalorder %v784_v1, 2 }
  0xad   : > { %v790_v19 = vor.u32 %v789_v6, %v788_v3  ;;  %v793_v20 = vor.u32 %v792_v8, %v791_v5  ;;  %v796_v21 = vor.u32 %v795_v11, %v794_v9  ;;  %v799_v22 = vor.u32 %v798_v14, %v797_v12 }
  0xae   : > { %v802_v23 = vor.u32 %v801_v17, %v800_v15  ;;  %vm805_vm6 = vcmp.lt.s32.totalorder %v784_v1, 3  ;;  %v685_v41 = vshll.u32 %v2240_v2, %v682_v60  ;;  %v686_v42 = vshrl.u32 %v2241_v4, %v683_v18 }
  0xaf   : > { %v808_v25 = vsel %vm806_vm4, %v796_v21, 2102212464  ;;  %v811_v26 = vsel %vm803_vm3, %v790_v19, %v793_v20  ;;  %v815_v27 = vsel %vm803_vm3, %v793_v20, %v796_v21  ;;  %v812_v28 = vsel %vm806_vm4, %v799_v22, 920167782 }
  0xb0   : > { %v816_v29 = vsel %vm806_vm4, %v802_v23, 1326507024  ;;  %v807_v30 = vsel %vm803_vm3, %v787_v24, %v790_v19  ;;  %v809_v35 = vsel %vm805_vm6, %v793_v20, %v808_v25  ;;  %v813_v36 = vsel %vm805_vm6, %v796_v21, %v812_v28 }
  0xb1   : > { %v817_v37 = vsel %vm805_vm6, %v799_v22, %v816_v29  ;;  %v814_v38 = vsel %vm804_vm5, %v811_v26, %v813_v36  ;;  %v810_v47 = vsel %vm804_vm5, %v807_v30, %v809_v35  ;;  %v684_v49 = vshrl.u32 %v2240_v2, %v683_v18 }
  0xb2   : > { %v818_v40 = vsel %vm804_vm5, %v815_v27, %v817_v37  ;;  %v2413_v45 = vmul.u32.u64.low %v2388_v59, %v814_v38  ;;  %v2414_v46 = vmul.u32.u64.high %v2388_v59, %v814_v38, %v2413_v45  ;;  %v688_v50 = vshll.u32 %v2241_v4, %v682_v60  ;;  %v1499_v37 = vld [vmem:[%s2854_s4 + $0x10] sm:$0xff] }
  0xb3   : > { %v2409_v43 = vmul.u32.u64.low %v2388_v59, %v818_v40  ;;  %v2410_v44 = vmul.u32.u64.high %v2388_v59, %v818_v40, %v2409_v43  ;;  %v689_v51 = vshrl.u32 %v2242_v7, %v683_v18  ;;  %v687_v52 = vor.u32 %v686_v42, %v685_v41  ;;  %v1498_v40 = vld [vmem:[%s2854_s4 + $0x8] sm:$0xff]  ;;  %1513 = vperm.xlu0 %2111, %v1499_v37  }
  0xb4   : > { %v691_v53 = vshll.u32 %v2242_v7, %v682_v60  ;;  %v692_v55 = vshrl.u32 %v2243_v10, %v683_v18  ;;  %v695_v56 = vshrl.u32 %v2244_v13, %v683_v18  ;;  %v694_v61 = vshll.u32 %v2243_v10, %v682_v60 }
  0xb5   : > { %v690_v57 = vor.u32 %v689_v51, %v688_v50  ;;  %v697_v1 = vshll.u32 %v2244_v13, %v682_v60  ;;  %v698_v3 = vshrl.u32 %v2245_v16, %v683_v18  ;;  %v826_v5 = vmul.u32 %v2388_v59, %v810_v47 }
  0xb6   : > { %vm828_vm7 = vc.u32 %v2410_v44, %v2413_v45  ;;  %v829_v6 = vadd.s32 1, %v2414_v46  ;;  %v693_v8 = vor.u32 %v692_v55, %v691_v53  ;;  %v696_v9 = vor.u32 %v695_v56, %v694_v61  ;;  %v1497_v53 = vld [vmem:[%s2854_s4] sm:$0xff]  ;;  %v1542_v61 = vld [vmem:[%s2856_s6 + $0x8] sm:$0xff] }
  0xb7   : > { %v699_v11 = vor.u32 %v698_v3, %v697_v1  ;;  %vm700_vm8 = vcmp.lt.s32.totalorder %v2393_v0, 1  ;;  %vm703_vm9 = vcmp.lt.s32.totalorder %v2393_v0, 4  ;;  %vm701_vm10 = vcmp.lt.s32.totalorder %v2393_v0, 2 }
  0xb8   : > { %v830_v12 = vsel %vm828_vm7, %v829_v6, %v2414_v46  ;;  %v705_v60 = vsel %vm703_vm9, %v693_v8, 2102212464  ;;  %v708_v14 = vsel %vm700_vm8, %v687_v52, %v690_v57  ;;  %vm702_vm11 = vcmp.lt.s32.totalorder %v2393_v0, 3  ;;  %v1544_v0 = vld [vmem:[%s2856_s6 + $0x18] sm:$0xff] }
  0xb9   : > { %v831_v15 = vadd.s32 %v830_v12, %v826_v5  ;;  %v709_v59 = vsel %vm703_vm9, %v696_v9, 920167782  ;;  %v712_v17 = vsel %vm700_vm8, %v690_v57, %v693_v8  ;;  %v704_v18 = vsel %vm700_vm8, %v684_v49, %v687_v52  ;;  %1562 = vperm.xlu0 %2111, %v1544_v0  }
  0xba   : > { %v710_v19 = vsel %vm702_vm11, %v693_v8, %v709_v59  ;;  %v713_v20 = vsel %vm703_vm9, %v699_v11, 1326507024  ;;  %v716_v21 = vshll.u32 %v676_v63, 8  ;;  %v706_v23 = vsel %vm702_vm11, %v690_v57, %v705_v60  ;;  %v1500_v63 = vld [vmem:[%s2854_s4 + $0x18] sm:$0xff]  ;;  %v1543_v59 = vld [vmem:[%s2856_s6 + $0x10] sm:$0xff] }
  0xbb   : > { %v832_v22 = vadd.s32 536870912, %v831_v15  ;;  %v711_v24 = vsel %vm701_vm10, %v708_v14, %v710_v19  ;;  %v714_v25 = vsel %vm702_vm11, %v696_v9, %v713_v20  ;;  %v579_v26 = vand.u32 31, %v2390_v62  ;;  %1518 = vperm.xlu1 %2110, %v1500_v63   ;;  %v1682_v20 = vld [vmem:[%s2858_s8 + $0x18] sm:$0xff] }
  0xbc   : > { %v715_v27 = vsel %vm701_vm10, %v712_v17, %v714_v25  ;;  %v2442_v28 = vmul.u32.u64.low %v716_v21, %v711_v24  ;;  %v2443_v29 = vmul.u32.u64.high %v716_v21, %v711_v24, %v2442_v28  ;;  %v707_v36 = vsel %vm701_vm10, %v704_v18, %v706_v23 }
  0xbd   : > { %v2446_v30 = vshrl.u32 %v832_v22, 30  ;;  %v2448_v35 = vmul.u32.u64.low %v716_v21, %v715_v27  ;;  %v2449_v54 = vmul.u32.u64.high %v716_v21, %v715_v27, %v2448_v35  ;;  %v2464_v41 = vsub.s32 32, %v579_v26  ;;  %1552 = vperm.xlu0 %2111, %v1542_v61  }
  0xbe   : > { %v726_v42 = vadd.s32 1, %v2443_v29  ;;  %v723_v46 = vmul.u32 %v716_v21, %v707_v36  ;;  %v565_v47 = vand.u32 2147483647, %v2372_v34  ;;  %v2477_v50 = vsel %vm473_vm12, %v2386_v58, 0  ;;  %v1541_v36 = vld [vmem:[%s2856_s6] sm:$0xff] }
  0xbf   : > { %v834_v38 = vshll.u32 %v2446_v30, 30  ;;  %vm725_vm13 = vc.u32 %v2449_v54, %v2442_v28  ;;  %1508 = vperm.xlu1 %2110, %v1498_v40   ;;  %v2484_v55 = vshrl.u32 %v2390_v62, 5  ;;  %v583_v56 = vshrl.u32 %v2241_v4, %v2464_v41 }
  0xc0   : > { %v727_v49 = vsel %vm725_vm13, %v726_v42, %v2443_v29  ;;  %v591_v57 = vshll.u32 %v2243_v10, %v579_v26  ;;  %v592_v58 = vshrl.u32 %v2244_v13, %v2464_v41  ;;  %v2497_v3 = vand.u32 8388607, %v565_v47 }
  0xc1   : > { %v2470_v43 = vsub.s32 %v831_v15, %v834_v38  ;;  %v728_v52 = vadd.s32 %v727_v49, %v723_v46  ;;  %v586_v62 = vshrl.u32 %v2242_v7, %v2464_v41  ;;  %v589_v5 = vshrl.u32 %v2243_v10, %v2464_v41  ;;  %1700 = vperm.xlu0 %2111, %v1682_v20  }
  0xc2   : > { %v582_v8 = vshll.u32 %v2240_v2, %v579_v26  ;;  %v593_v9 = vor.u32 %v592_v58, %v591_v57  ;;  %v595_v11 = vshrl.u32 %v2245_v16, %v2464_v41  ;;  %v857_v60 = vsub.s32 4, %v2446_v30  ;;  %v1681_v57 = vld [vmem:[%s2858_s8 + $0x10] sm:$0xff] }
  0xc3   : > { %v837_v51 = vsub.s32 0, %v2470_v43  ;;  %v729_v6 = vadd.s32 536870912, %v728_v52  ;;  %1503 = vperm.xlu1 %2110, %v1497_v53   ;;  %v585_v14 = vshll.u32 %v2241_v4, %v579_v26  ;;  %v588_v15 = vshll.u32 %v2242_v7, %v579_v26 }
  0xc4   : > { %v584_v18 = vor.u32 %v583_v56, %v582_v8  ;;  %v594_v19 = vshll.u32 %v2244_v13, %v579_v26  ;;  %vm600_vm0 = vcmp.lt.s32.totalorder %v2484_v55, 4  ;;  %v2527_v25 = vand.u32 31, %v2477_v50 }
  0xc5   : > { %v1999_v1 = vmin.u32 %v837_v51, %v2470_v43  ;;  %v2513_v17 = vshrl.u32 %v729_v6, 30  ;;  %v587_v23 = vor.u32 %v586_v62, %v585_v14  ;;  %v590_v24 = vor.u32 %v589_v5, %v588_v15 }
  0xc6   : > { %v596_v27 = vor.u32 %v595_v11, %v594_v19  ;;  %v606_v29 = vsel %vm600_vm0, %v593_v9, 920167782  ;;  %v827_v39 = vadd.s32 %v2413_v45, %v2410_v44  ;;  %v858_v35 = vsel %vm773_vm14, %v857_v60, %v2446_v30  ;;  %v1680_v44 = vld [vmem:[%s2858_s8 + $0x8] sm:$0xff] }
  0xc7   : > { %v839_v12 = vclz %v1999_v1  ;;  %v731_v26 = vshll.u32 %v2513_v17, 30  ;;  %1557 = vperm.xlu1 %2110, %v1543_v59   ;;  %v573_v63 = vor.u32 8388608, %v2497_v3  ;;  %vm597_vm2 = vcmp.lt.s32.totalorder %v2484_v55, 1  ;;  %1690 = vperm.xlu0 %2111, %v1680_v44   ;;  %v1813_v3 = vld [vmem:[%s2860_s10] sm:$0x3] }
  0xc8   : > { %vm599_vm3 = vcmp.lt.s32.totalorder %v2484_v55, 3  ;;  %v605_v40 = vsel %vm597_vm2, %v584_v18, %v587_v23  ;;  %vm598_vm4 = vcmp.lt.s32.totalorder %v2484_v55, 2  ;;  %v609_v46 = vsel %vm597_vm2, %v587_v23, %v590_v24  ;;  %v1679_v59 = vld [vmem:[%s2858_s8] sm:$0xff] }
  0xc9   : > { %v2000_v22 = vadd.s32 4294967294, %v839_v12  ;;  %v2541_v38 = vsub.s32 %v728_v52, %v731_v26  ;;  %v607_v42 = vsel %vm599_vm3, %v590_v24, %v606_v29  ;;  %v610_v49 = vsel %vm600_vm0, %v596_v27, 1326507024 }
  0xca   : > { %v611_v56 = vsel %vm599_vm3, %v593_v9, %v610_v49  ;;  %v581_v61 = vshrl.u32 %v2240_v2, %v2464_v41  ;;  %v602_v1 = vsel %vm600_vm0, %v590_v24, 2102212464  ;;  %v613_v8 = vshll.u32 %v573_v63, 8 }
  0xcb   : > { %vm2001_vm1 = vcmp.lt.s32.totalorder %v2000_v22, 0  ;;  %v734_v0 = vsub.s32 0, %v2541_v38  ;;  %1547 = vperm.xlu1 %2110, %v1541_v36   ;;  %v612_v6 = vsel %vm598_vm4, %v609_v46, %v611_v56  ;;  %v860_v9 = vsel %vm2521_vm15, 0, %v858_v35  ;;  %1816 = vperm.xlu0 %2111, %v1813_v3  }
  0xcc   : > { %v842_v37 = vsel %vm2001_vm1, 0, %v2000_v22  ;;  %v601_v11 = vsel %vm597_vm2, %v581_v61, %v584_v18  ;;  %v603_v60 = vsel %vm599_vm3, %v587_v23, %v602_v1  ;;  %v2593_v18 = vshrl.u32 %v2477_v50, 5 }
  0xcd   : > { %v843_v45 = vsub.s32 32, %v842_v37  ;;  %v847_v30 = vsub.s32 4294967266, %v842_v37  ;;  %v844_v51 = vshll.u32 %v2470_v43, %v842_v37  ;;  %v1995_v58 = vmin.u32 %v734_v0, %v2541_v38 }
  0xce   : > { %v608_v43 = vsel %vm598_vm4, %v605_v40, %v607_v42  ;;  %v2582_v14 = vmul.u32.u64.low %v613_v8, %v612_v6  ;;  %v2583_v15 = vmul.u32.u64.high %v613_v8, %v612_v6, %v2582_v14  ;;  %v477_v24 = vsub.s32 32, %v2527_v25 }
  0xcf   : > { %v845_v52 = vshrl.u32 %v827_v39, %v843_v45  ;;  %v848_v53 = vadd.s32 127, %v847_v30  ;;  %v736_v41 = vclz %v1995_v58  ;;  %1695 = vperm.xlu1 %2110, %v1681_v57   ;;  %v1283_v27 = vadd.s32 3, %v860_v9 }
  0xd0   : > { %v2588_v20 = vmul.u32.u64.low %v613_v8, %v608_v43  ;;  %v2589_v22 = vmul.u32.u64.high %v613_v8, %v608_v43, %v2588_v20  ;;  %v724_v29 = vadd.s32 %v2442_v28, %v2449_v54  ;;  %v604_v39 = vsel %vm598_vm4, %v601_v11, %v603_v60 }
  0xd1   : > { %v846_v62 = vor.u32 %v845_v52, %v844_v51  ;;  %v849_v5 = vshll.u32 %v848_v53, 23  ;;  %v1996_v19 = vadd.s32 4294967294, %v736_v41  ;;  %v2600_v63 = vand.u32 3, %v860_v9 }
  0xd2   : > { %vm622_vm6 = vc.u32 %v2583_v15, %v2588_v20  ;;  %v754_v44 = vsub.s32 4, %v2513_v17  ;;  %v623_v45 = vadd.s32 1, %v2589_v22  ;;  %v620_v28 = vmul.u32 %v613_v8, %v604_v39 }
  0xd3   : > { %v850_v12 = vor.u32 4788187, %v849_v5  ;;  %v853_v23 = vcvt.s32.f32 %v846_v62  ;;  %vm1997_vm5 = vcmp.lt.s32.totalorder %v1996_v19, 0  ;;  %1685 = vperm.xlu1 %2110, %v1679_v59   ;;  %v462_v54 = vand.u32 2147483647, %v2370_v33 }
  0xd4   : > { %v739_v36 = vsel %vm1997_vm5, 0, %v1996_v19  ;;  %v480_v55 = vshrl.u32 %v2241_v4, %v477_v24  ;;  %v624_v46 = vsel %vm622_vm6, %v623_v45, %v2589_v22  ;;  %v479_v52 = vshll.u32 %v2240_v2, %v2527_v25 }
  0xd5   : > { %v851_v26 = vand.u32 2147483647, %v850_v12  ;;  %v740_v50 = vsub.s32 32, %v739_v36  ;;  %v744_v37 = vsub.s32 4294967266, %v739_v36  ;;  %v741_v40 = vshll.u32 %v2541_v38, %v739_v36 }
  0xd6   : > { %v625_v51 = vadd.s32 %v624_v46, %v620_v28  ;;  %v483_v53 = vshrl.u32 %v2242_v7, %v477_v24  ;;  %v482_v38 = vshll.u32 %v2241_v4, %v2527_v25  ;;  %v485_v1 = vshll.u32 %v2242_v7, %v2527_v25 }
  0xd7   : > { %v854_v35 = vmul.f32 %v853_v23, %v851_v26  ;;  %v742_v42 = vshrl.u32 %v724_v29, %v740_v50  ;;  %v745_v0 = vadd.s32 127, %v744_v37  ;;  %v486_v43 = vshrl.u32 %v2243_v10, %v477_v24 }
  0xd8   : > { %v626_v61 = vadd.s32 536870912, %v625_v51  ;;  %v478_v62 = vshrl.u32 %v2240_v2, %v477_v24  ;;  %v481_v5 = vor.u32 %v480_v55, %v479_v52  ;;  %v484_v21 = vor.u32 %v483_v53, %v482_v38 }
  0xd9   : > { %v855_v30 = vxor.u32 2147483648, %v854_v35  ;;  %v743_v57 = vor.u32 %v742_v42, %v741_v40  ;;  %v746_v58 = vshll.u32 %v745_v0, 23  ;;  %v487_v8 = vor.u32 %v486_v43, %v485_v1 }
  0xda   : > { %v2624_v6 = vshrl.u32 %v626_v61, 30  ;;  %v489_v9 = vshrl.u32 %v2244_v13, %v477_v24  ;;  %v488_v11 = vshll.u32 %v2243_v10, %v2527_v25  ;;  %v492_v7 = vshrl.u32 %v2245_v16, %v477_v24 }
  0xdb   : > { %v856_v49 = vsel %vm773_vm14, %v855_v30, %v854_v35  ;;  %v747_v3 = vor.u32 4788187, %v746_v58  ;;  %v750_v4 = vcvt.s32.f32 %v743_v57  ;;  %v469_v60 = vand.u32 8388607, %v462_v54 }
  0xdc   : > { %v859_v56 = vsel %vm2521_vm15, %v2368_v32, %v856_v49  ;;  %v628_v12 = vshll.u32 %v2624_v6, 30  ;;  %v491_v2 = vshll.u32 %v2244_v13, %v2527_v25  ;;  %vm494_vm7 = vcmp.lt.s32.totalorder %v2593_v18, 1 }
  0xdd   : > { %2112 = vcosq.f32 %v859_v56  ;;  %v748_v41 = vand.u32 2147483647, %v747_v3  ;;  %v490_v59 = vor.u32 %v489_v9, %v488_v11  ;;  %vm497_vm8 = vcmp.lt.s32.totalorder %v2593_v18, 4 }
  0xde   : > { %2114 = vsinq.f32 %v859_v56  ;;  %v498_v19 = vsel %vm494_vm7, %v478_v62, %v481_v5  ;;  %v2639_v10 = vsub.s32 %v625_v51, %v628_v12  ;;  %v493_v16 = vor.u32 %v492_v7, %v491_v2 }
  0xdf   : > { %v751_v14 = vmul.f32 %v750_v4, %v748_v41  ;;  %vm496_vm9 = vcmp.lt.s32.totalorder %v2593_v18, 3  ;;  %v499_v22 = vsel %vm497_vm8, %v487_v8, 2102212464  ;;  %v1284_v24 = vand.u32 3, %v1283_v27 }
  0xe0   : > { %vm495_vm10 = vcmp.lt.s32.totalorder %v2593_v18, 2  ;;  %v500_v13 = vsel %vm496_vm9, %v484_v21, %v499_v22  ;;  %vm2649_vm11 = vcmp.le.f32.partialorder %v668_v48, 0.7853982  ;;  %vm670_vm12 = vcmp.lt.s32.totalorder %v2366_v31, 0 }
  0xe1   : > { %v752_v26 = vxor.u32 2147483648, %v751_v14  ;;  %v631_v23 = vsub.s32 0, %v2639_v10  ;;  %v2657_v29 = vsel %vm495_vm10, %v498_v19, %v500_v13  ;;  %vm865_vm13 = vcmp.lt.s32.totalorder %v2600_v63, 2 }
  0xe2   : > { %vm866_vm14 = vcmp.eq.s32.totalorder %v2600_v63, 0  ;;  %v755_v39 = vsel %vm670_vm12, %v754_v44, %v2513_v17  ;;  %v470_v35 = vor.u32 8388608, %v469_v60  ;;  %vm863_vm15 = vweird.f32 %v2368_v32 }
  0xe3   : > { %v753_v27 = vsel %vm670_vm12, %v752_v26, %v751_v14  ;;  %v1991_v36 = vmin.u32 %v631_v23, %v2639_v10  ;;  %v503_v50 = vsel %vm497_vm8, %v490_v59, 920167782  ;;  %v507_v37 = vsel %vm497_vm8, %v493_v16, 1326507024 }
  0xe4   : > { %v756_v48 = vsel %vm2649_vm11, %v2366_v31, %v753_v27  ;;  %vm1285_vm0 = vcmp.lt.s32.totalorder %v1284_v24, 2  ;;  %vm869_vm1 = vcmp.eq.s32.totalorder %v2600_v63, 2  ;;  %v506_v17 = vsel %vm494_vm7, %v484_v21, %v487_v8 }
  0xe5   : > { %2116 = vcosq.f32 %v756_v48  ;;  %vm1286_vm2 = vcmp.eq.s32.totalorder %v1284_v24, 0  ;;  %v757_v44 = vsel %vm2649_vm11, 0, %v755_v39  ;;  %v633_v45 = vclz %v1991_v36 }
  0xe6   : > { %2118 = vsinq.f32 %v756_v48  ;;  %v502_v28 = vsel %vm494_vm7, %v481_v5, %v484_v21  ;;  %v504_v55 = vsel %vm496_vm9, %v487_v8, %v503_v50  ;;  %v508_v40 = vsel %vm496_vm9, %v490_v59, %v507_v37 }
  0xe7   : > { %v510_v42 = vshll.u32 %v470_v35, 8  ;;  %v1992_v49 = vadd.s32 4294967294, %v633_v45  ;;  %v509_v51 = vsel %vm495_vm10, %v506_v17, %v508_v40  ;;  %vm1289_vm3 = vcmp.eq.s32.totalorder %v1284_v24, 2 }
  0xe8   : > { %v2246_v57 = vmov 0.0   ;;  %v1179_v61 = vadd.s32 3, %v757_v44  ;;  %v505_v62 = vsel %vm495_vm10, %v502_v28, %v504_v55  ;;  %v621_v8 = vadd.s32 %v2588_v20, %v2583_v15 }
  0xe9   : > { %v2684_v53 = vmul.u32.u64.low %v510_v42, %v509_v51  ;;  %v2685_v56 = vmul.u32.u64.high %v510_v42, %v509_v51, %v2684_v53  ;;  %1371 = vmatprep.mubr.f32.mxu0 %v2246_v57  ;;  %1472 = vmatprep.mubr.f32.mxu1 %v2246_v57  ;;  %vm1993_vm4 = vcmp.lt.s32.totalorder %v1992_v49, 0  ;;  %v761_v11 = vand.u32 3, %v757_v44 }
  0xea   : > { %v2113_v30 = vpop.eup %2112  ;;  %v636_v3 = vsel %vm1993_vm4, 0, %v1992_v49  ;;  %v2706_v60 = vmul.u32.u64.low %v510_v42, %v505_v62  ;;  %v2707_v63 = vmul.u32.u64.high %v510_v42, %v505_v62, %v2706_v60  ;;  %v1180_v2 = vand.u32 3, %v1179_v61 }
  0xeb   : > { %v2115_v0 = vpop.eup %2114  ;;  %v870_v46 = vxor.u32 2147483648, %v2113_v30  ;;  %v637_v9 = vsub.s32 32, %v636_v3  ;;  %v641_v7 = vsub.s32 4294967266, %v636_v3  ;;  %v638_v18 = vshll.u32 %v2639_v10, %v636_v3 }
  0xec   : > { %v867_v52 = vxor.u32 2147483648, %v2115_v0  ;;  %v518_v20 = vadd.s32 %v2706_v60, %v2685_v56  ;;  %vm519_vm5 = vc.u32 %v2685_v56, %v2706_v60  ;;  %vm760_vm6 = vweird.f32 %v2366_v31 }
  0xed   : > { %v1291_v58 = vsel %vm1289_vm3, %v870_v46, %v2115_v0  ;;  %v871_v38 = vsel %vm869_vm1, %v870_v46, %v2115_v0  ;;  %v639_v12 = vshrl.u32 %v621_v8, %v637_v9  ;;  %v642_v14 = vadd.s32 127, %v641_v7 }
  0xee   : > { %v1288_v1 = vsel %vm1286_vm2, %v2113_v30, %v867_v52  ;;  %v868_v43 = vsel %vm866_vm14, %v2113_v30, %v867_v52  ;;  %vm763_vm7 = vcmp.eq.s32.totalorder %v761_v11, 0  ;;  %vm766_vm8 = vcmp.eq.s32.totalorder %v761_v11, 2 }
  0xef   : > { %v1292_v5 = vsel %vm1285_vm0, %v1288_v1, %v1291_v58  ;;  %v872_v21 = vsel %vm865_vm13, %v868_v43, %v871_v38  ;;  %v640_v15 = vor.u32 %v639_v12, %v638_v18  ;;  %v643_v59 = vshll.u32 %v642_v14, 23 }
  0xf0   : > { %v1293_v41 = vsel %vm863_vm15, nan, %v1292_v5  ;;  %v873_v4 = vsel %vm863_vm15, nan, %v872_v21  ;;  %v520_v19 = vadd.s32 1, %v2707_v63  ;;  %vm1182_vm9 = vcmp.eq.s32.totalorder %v1180_v2, 0 }
  0xf1   : > { %1335 = vmatprep.subr.mxu0 %v1293_v41  ;;  %1436 = vmatprep.subr.mxu1 %v873_v4  ;;  %v644_v22 = vor.u32 4788187, %v643_v59  ;;  %v517_v24 = vmul.u32 %v510_v42, %v2657_v29  ;;  %vm1185_vm10 = vcmp.eq.s32.totalorder %v1180_v2, 2  ;;  %v647_v13 = vcvt.s32.f32 %v640_v15 }
  0xf2   : > { %v2117_v32 = vpop.eup %2116  ;;  %v521_v25 = vsel %vm519_vm5, %v520_v19, %v2707_v63  ;;  %vm1181_vm11 = vcmp.lt.s32.totalorder %v1180_v2, 2  ;;  %vm762_vm12 = vcmp.lt.s32.totalorder %v761_v11, 2  ;;  %vm567_vm13 = vcmp.lt.s32.totalorder %v2372_v34, 0 }
  0xf3   : > { %v2119_v10 = vpop.eup %2118  ;;  %v767_v16 = vxor.u32 2147483648, %v2117_v32  ;;  %v645_v39 = vand.u32 2147483647, %v644_v22  ;;  %v522_v35 = vadd.s32 %v521_v25, %v517_v24  ;;  %v651_v55 = vsub.s32 4, %v2624_v6 }
  0xf4   : > { %v764_v26 = vxor.u32 2147483648, %v2119_v10  ;;  %vm566_vm14 = vcmp.le.f32.partialorder %v565_v47, 0.7853982 }
  0xf5   : > { %v1187_v23 = vsel %vm1185_vm10, %v767_v16, %v2119_v10  ;;  %v768_v27 = vsel %vm766_vm8, %v767_v16, %v2119_v10  ;;  %v648_v17 = vmul.f32 %v647_v13, %v645_v39  ;;  %v523_v44 = vadd.s32 536870912, %v522_v35 }
  0xf6   : > { %v1184_v48 = vsel %vm1182_vm9, %v2117_v32, %v764_v26  ;;  %v765_v36 = vsel %vm763_vm7, %v2117_v32, %v764_v26  ;;  %v652_v31 = vsel %vm567_vm13, %v651_v55, %v2624_v6  ;;  %vm464_vm7 = vcmp.lt.s32.totalorder %v2370_v33, 0  ;;  %v876_v55 = vld [vmem:[%s2853_s3 + $0x10] sm:$0xff] }
  0xf7   : > { %v1188_v50 = vsel %vm1181_vm11, %v1184_v48, %v1187_v23  ;;  %v769_v37 = vsel %vm762_vm12, %v765_v36, %v768_v27  ;;  %v649_v30 = vxor.u32 2147483648, %v648_v17  ;;  %v524_v28 = vshrl.u32 %v523_v44, 30  ;;  %v874_v44 = vld [vmem:[%s2853_s3] sm:$0xff] }
  0xf8   : > { %v1189_v29 = vsel %vm760_vm6, nan, %v1188_v50  ;;  %v770_v45 = vsel %vm760_vm6, nan, %v769_v37  ;;  %v654_v51 = vsel %vm566_vm14, 0, %v652_v31  ;;  %vm657_vm6 = vweird.f32 %v2372_v34 }
  0xf9   : > { %1336 = vmatpush1.msra.mxu0 %v1189_v29  ;;  %1437 = vmatpush1.msra.mxu1 %v770_v45  ;;  %v650_v40 = vsel %vm567_vm13, %v649_v30, %v648_v17  ;;  %v525_v42 = vshll.u32 %v524_v28, 30  ;;  %v1075_v56 = vadd.s32 3, %v654_v51  ;;  %v658_v38 = vand.u32 3, %v654_v51  ;;  %v458_v29 = vld [vmem:[%s2852_s2] sm:$0xff] }
  0xfa   : > { %v653_v0 = vsel %vm566_vm14, %v2372_v34, %v650_v40  ;;  %v548_v10 = vsub.s32 4, %v524_v28  ;;  %vm463_vm8 = vcmp.le.f32.partialorder %v462_v54, 0.7853982  ;;  %v460_v40 = vld [vmem:[%s2852_s2 + $0x10] sm:$0xff] }
  0xfb   : > { %2120 = vcosq.f32 %v653_v0  ;;  %v526_v46 = vsub.s32 %v522_v35, %v525_v42  ;;  %v1076_v61 = vand.u32 3, %v1075_v56  ;;  %vm660_vm0 = vcmp.eq.s32.totalorder %v658_v38, 0  ;;  %v877_v42 = vld [vmem:[%s2853_s3 + $0x18] sm:$0xff] }
  0xfc   : > { %2122 = vsinq.f32 %v653_v0  ;;  %vm663_vm3 = vcmp.eq.s32.totalorder %v658_v38, 2  ;;  %vm659_vm5 = vcmp.lt.s32.totalorder %v658_v38, 2  ;;  %v549_v22 = vsel %vm464_vm7, %v548_v10, %v524_v28  ;;  %v459_v28 = vld [vmem:[%s2852_s2 + $0x8] sm:$0xff]  ;;  %v461_v0 = vld [vmem:[%s2852_s2 + $0x18] sm:$0xff] }
  0xfd   : > { %v528_v49 = vsub.s32 0, %v526_v46  ;;  %vm1078_vm1 = vcmp.eq.s32.totalorder %v1076_v61, 0  ;;  %vm1081_vm2 = vcmp.eq.s32.totalorder %v1076_v61, 2  ;;  %vm1077_vm4 = vcmp.lt.s32.totalorder %v1076_v61, 2 }
  0xfe   : > { %v551_v24 = vsel %vm463_vm8, 0, %v549_v22 }
  0xff   : > { %v1987_v52 = vmin.u32 %v528_v49, %v526_v46  ;;  %v971_v26 = vadd.s32 3, %v551_v24  ;;  %v555_v25 = vand.u32 3, %v551_v24 }
 0x101   : > { %v530_v53 = vclz %v1987_v52  ;;  %v972_v13 = vand.u32 3, %v971_v26  ;;  %vm560_vm10 = vcmp.eq.s32.totalorder %v555_v25, 2  ;;  %vm557_vm12 = vcmp.eq.s32.totalorder %v555_v25, 0 }
 0x102   : > { %vm556_vm14 = vcmp.lt.s32.totalorder %v555_v25, 2 }
 0x103   : > { %v1988_v58 = vadd.s32 4294967294, %v530_v53  ;;  %vm977_vm9 = vcmp.eq.s32.totalorder %v972_v13, 2  ;;  %vm974_vm11 = vcmp.eq.s32.totalorder %v972_v13, 0  ;;  %vm973_vm13 = vcmp.lt.s32.totalorder %v972_v13, 2 }
 0x105   : > { %vm1989_vm15 = vcmp.lt.s32.totalorder %v1988_v58, 0 }
 0x106   : > { %v533_v1 = vsel %vm1989_vm15, 0, %v1988_v58  ;;  %vm554_vm15 = vweird.f32 %v2370_v33 }
 0x107   : > { %v534_v47 = vsub.s32 32, %v533_v1  ;;  %v538_v43 = vsub.s32 4294967266, %v533_v1  ;;  %v535_v21 = vshll.u32 %v526_v46, %v533_v1 }
 0x108   : > { %v2121_v3 = vpop.eup %2120 }
 0x109   : > { %v2123_v62 = vpop.eup %2122  ;;  %v664_v5 = vxor.u32 2147483648, %v2121_v3  ;;  %v536_v8 = vshrl.u32 %v518_v20, %v534_v47  ;;  %v539_v6 = vadd.s32 127, %v538_v43 }
 0x10a   : > { %v661_v9 = vxor.u32 2147483648, %v2123_v62 }
 0x10b   : > { %v1083_v41 = vsel %vm1081_vm2, %v664_v5, %v2123_v62  ;;  %v665_v4 = vsel %vm663_vm3, %v664_v5, %v2123_v62  ;;  %v537_v11 = vor.u32 %v536_v8, %v535_v21  ;;  %v540_v7 = vshll.u32 %v539_v6, 23 }
 0x10c   : > { %v1080_v18 = vsel %vm1078_vm1, %v2121_v3, %v661_v9  ;;  %v662_v12 = vsel %vm660_vm0, %v2121_v3, %v661_v9  ;;  %vm1294_vm0 = vcmask 130048   ;;  %vm1565_vm1 = vcmask 261120  }
 0x10d   : > { %v1084_v60 = vsel %vm1077_vm4, %v1080_v18, %v1083_v41  ;;  %v666_v63 = vsel %vm659_vm5, %v662_v12, %v665_v4  ;;  %v541_v2 = vor.u32 4788187, %v540_v7  ;;  %v544_v59 = vcvt.s32.f32 %v537_v11 }
 0x10e   : > { %v1085_v14 = vsel %vm657_vm6, nan, %v1084_v60  ;;  %v667_v15 = vsel %vm657_vm6, nan, %v666_v63 }
 0x10f   : > { %1337 = vmatprep.subr.mxu0 %v1085_v14  ;;  %1438 = vmatprep.subr.mxu1 %v667_v15  ;;  %v542_v20 = vand.u32 2147483647, %v541_v2 }
 0x111   : > { %v545_v32 = vmul.f32 %v544_v59, %v542_v20 }
 0x113   : > { %v546_v19 = vxor.u32 2147483648, %v545_v32 }
 0x115   : > { %v547_v16 = vsel %vm464_vm7, %v546_v19, %v545_v32 }
 0x116   : > { %v550_v34 = vsel %vm463_vm8, %v2370_v33, %v547_v16  ;;  %v875_v33 = vld [vmem:[%s2853_s3 + $0x8] sm:$0xff] }
 0x117   : > { %2124 = vcosq.f32 %v550_v34 }
 0x118   : > { %2126 = vsinq.f32 %v550_v34 }
 0x124   : > { %v2125_v23 = vpop.eup %2124 }
 0x125   : > { %v2127_v27 = vpop.eup %2126  ;;  %v561_v39 = vxor.u32 2147483648, %v2125_v23 }
 0x126   : > { %v558_v35 = vxor.u32 2147483648, %v2127_v27 }
 0x127   : > { %v979_v48 = vsel %vm977_vm9, %v561_v39, %v2127_v27  ;;  %v562_v54 = vsel %vm560_vm10, %v561_v39, %v2127_v27  ;;  %v1538_v39 = vld [vmem:[%s2855_s5 + $0x8] sm:$0xff] }
 0x128   : > { %v976_v36 = vsel %vm974_vm11, %v2125_v23, %v558_v35  ;;  %v559_v50 = vsel %vm557_vm12, %v2125_v23, %v558_v35  ;;  %v1537_v23 = vld [vmem:[%s2855_s5] sm:$0xff]  ;;  %v1539_v35 = vld [vmem:[%s2855_s5 + $0x10] sm:$0xff] }
 0x129   : > { %v980_v37 = vsel %vm973_vm13, %v976_v36, %v979_v48  ;;  %v563_v17 = vsel %vm556_vm14, %v559_v50, %v562_v54  ;;  %v1540_v48 = vld [vmem:[%s2855_s5 + $0x18] sm:$0xff] }
 0x12a   : > { %v981_v45 = vsel %vm554_vm15, nan, %v980_v37  ;;  %v564_v30 = vsel %vm554_vm15, nan, %v563_v17 }
 0x12b   : > { %1338 = vmatpush1.msra.mxu0 %v981_v45  ;;  %1439 = vmatpush1.msra.mxu1 %v564_v30 }
 0x12c   : > { %2018 = vmatmul.mubr.msk.f32.vlgmr.msra.gmra.mxu0 %vm1294_vm0, %v874_v44  ;;  %2022 = vmatmul.mubr.msk.f32.vlgmr.msra.gmra.mxu1 %vm1294_vm0, %v458_v29 }
 0x12d   : > { %1377 = vmatprep.mubr.f32.mxu0 %v2246_v57  ;;  %1478 = vmatprep.mubr.f32.mxu1 %v2246_v57 }
 0x12e   : > { %v1514_v7 = vpop.permute.xlu0 %1513 }
 0x130   : > { %2019 = vmatmul.mubr.msk.f32.gmra.mxu0 %vm1294_vm0, %v875_v33  ;;  %2023 = vmatmul.mubr.msk.f32.gmra.mxu1 %vm1294_vm0, %v459_v28 }
 0x131   : > { %1383 = vmatprep.mubr.f32.mxu0 %v2246_v57  ;;  %1484 = vmatprep.mubr.f32.mxu1 %v2246_v57 }
 0x134   : > { %2020 = vmatmul.mubr.msk.f32.gmra.mxu0 %vm1294_vm0, %v876_v55  ;;  %2024 = vmatmul.mubr.msk.f32.gmra.mxu1 %vm1294_vm0, %v460_v40  ;;  %v1563_v44 = vpop.permute.xlu0 %1562 }
 0x135   : > { %1389 = vmatprep.mubr.f32.mxu0 %v2246_v57  ;;  %1490 = vmatprep.mubr.f32.mxu1 %v2246_v57 }
 0x136   : > { %v1519_v38 = vpop.permute.xlu1 %1518 }
 0x138   : > { %2021 = vmatmul.mubr.msk.f32.gmra.mxu0 %vm1294_vm0, %v877_v42  ;;  %2025 = vmatmul.mubr.msk.f32.gmra.mxu1 %vm1294_vm0, %v461_v0  ;;  %v1553_v42 = vpop.permute.xlu0 %1552 }
 0x139   : > { %1642 = vmatprep.mubr.f32.mxu0 %v2246_v57  ;;  %1779 = vmatprep.mubr.f32.mxu1 %v2246_v57 }
 0x13a   : > { %v1509_v5 = vpop.permute.xlu1 %1508 }
 0x13e   : > { %v1504_v59 = vpop.permute.xlu1 %1503 }
 0x142   : > { %v1558_v45 = vpop.permute.xlu1 %1557 }
 0x1ec   : > { %v1373_v46 = vpop.f32.mrf.mxu0  ;;  %v1474_v31 = vpop.f32.mrf.mxu1 }
 0x1ed   : > { %v1475_v14 = vadd.f32 %v1474_v31, %v1373_v46  ;;  %v1548_v31 = vpop.permute.xlu1 %1547 }
 0x1ee   : > { %v1375_v49 = vpop.f32.mrf.mxu0  ;;  %v1476_v51 = vpop.f32.mrf.mxu1 }
 0x1ef   : > { %v1477_v60 = vadd.f32 %v1476_v51, %v1375_v49  ;;  %v1521_v10 = vadd.f32 %v1504_v59, %v1475_v14 }
 0x1f0   : > { %v1379_v52 = vpop.f32.mrf.mxu0  ;;  %v1480_v53 = vpop.f32.mrf.mxu1 }
 0x1f1   : > { %v1481_v18 = vadd.f32 %v1480_v53, %v1379_v52  ;;  %v1522_v19 = vadd.f32 %v1504_v59, %v1477_v60 }
 0x1f2   : > { %v1381_v56 = vpop.f32.mrf.mxu0  ;;  %v1482_v58 = vpop.f32.mrf.mxu1 }
 0x1f3   : > { %v1483_v4 = vadd.f32 %v1482_v58, %v1381_v56  ;;  %v1523_v32 = vadd.f32 %v1509_v5, %v1481_v18  ;;  %v1696_v18 = vpop.permute.xlu1 %1695 }
 0x1f4   : > { %v1385_v61 = vpop.f32.mrf.mxu0  ;;  %v1486_v1 = vpop.f32.mrf.mxu1 }
 0x1f5   : > { %v1487_v6 = vadd.f32 %v1486_v1, %v1385_v61  ;;  %v1524_v20 = vadd.f32 %v1509_v5, %v1483_v4  ;;  %v1677_v5 = vld [vmem:[%s2857_s7 + $0x10] sm:$0xff] }
 0x1f6   : > { %v1387_v47 = vpop.f32.mrf.mxu0  ;;  %v1488_v43 = vpop.f32.mrf.mxu1 }
 0x1f7   : > { %v1489_v21 = vadd.f32 %v1488_v43, %v1387_v47  ;;  %v1525_v15 = vadd.f32 %v1514_v7, %v1487_v6  ;;  %v1675_v43 = vld [vmem:[%s2857_s7] sm:$0xff]  ;;  %v1686_v59 = vpop.permute.xlu1 %1685 }
 0x1f8   : > { %v1391_v3 = vpop.f32.mrf.mxu0  ;;  %v1492_v62 = vpop.f32.mrf.mxu1 }
 0x1f9   : > { %v1493_v8 = vadd.f32 %v1492_v62, %v1391_v3  ;;  %v1526_v63 = vadd.f32 %v1514_v7, %v1489_v21  ;;  %v1676_v62 = vld [vmem:[%s2857_s7 + $0x8] sm:$0xff]  ;;  %v1678_v21 = vld [vmem:[%s2857_s7 + $0x18] sm:$0xff] }
 0x1fa   : > { %v1393_v9 = vpop.f32.mrf.mxu0  ;;  %v1494_v41 = vpop.f32.mrf.mxu1 }
 0x1fb   : > { %v1495_v11 = vadd.f32 %v1494_v41, %v1393_v9  ;;  %v1527_v12 = vadd.f32 %v1519_v38, %v1493_v8 }
 0x1fd   : > { %v1528_v2 = vadd.f32 %v1519_v38, %v1495_v11  ;;  %v1701_v11 = vpop.permute.xlu0 %1700 }
 0x1ff   : > { %2128 = vtanh.f32 %v1528_v2 }
 0x200   : > { %2130 = vtanh.f32 %v1527_v12 }
 0x201   : > { %2132 = vtanh.f32 %v1526_v63 }
 0x202   : > { %2134 = vtanh.f32 %v1525_v15 }
 0x203   : > { %2136 = vtanh.f32 %v1524_v20 }
 0x204   : > { %2138 = vtanh.f32 %v1523_v32 }
 0x205   : > { %2140 = vtanh.f32 %v1522_v19 }
 0x206   : > { %2142 = vtanh.f32 %v1521_v10 }
 0x20c   : > { %v2129_v16 = vpop.eup %2128 }
 0x20d   : > { %v2131_v34 = vpop.eup %2130  ;;  %1602 = vmatprep.subr.mxu0 %v2129_v16 }
 0x20e   : > { %v2133_v22 = vpop.eup %2132  ;;  %1603 = vmatpush1.msra.mxu0 %v2131_v34 }
 0x20f   : > { %v2135_v24 = vpop.eup %2134  ;;  %1604 = vmatprep.subr.mxu0 %v2133_v22 }
 0x210   : > { %v2137_v26 = vpop.eup %2136  ;;  %1605 = vmatpush1.msra.mxu0 %v2135_v24 }
 0x211   : > { %v2139_v13 = vpop.eup %2138  ;;  %1606 = vmatprep.subr.mxu0 %v2137_v26 }
 0x212   : > { %v2141_v25 = vpop.eup %2140  ;;  %1607 = vmatpush1.msra.mxu0 %v2139_v13 }
 0x213   : > { %v2143_v27 = vpop.eup %2142  ;;  %1608 = vmatprep.subr.mxu0 %v2141_v25 }
 0x214   : > { %1609 = vmatpush1.msra.mxu0 %v2143_v27 }
 0x215   : > { %2026 = vmatmul.mubr.msk.f32.vlgmr.msra.gmra.mxu0 %vm1565_vm1, %v1537_v23  ;;  %v1812_v23 = vld [vmem:[%s2859_s9] sm:$0x3] }
 0x216   : > { %1648 = vmatprep.mubr.f32.mxu0 %v2246_v57 }
 0x219   : > { %2027 = vmatmul.mubr.msk.f32.gmra.mxu0 %vm1565_vm1, %v1538_v39 }
 0x21a   : > { %1654 = vmatprep.mubr.f32.mxu0 %v2246_v57 }
 0x21d   : > { %2028 = vmatmul.mubr.msk.f32.gmra.mxu0 %vm1565_vm1, %v1539_v35 }
 0x21e   : > { %1660 = vmatprep.mubr.f32.mxu0 %v2246_v57 }
 0x221   : > { %2029 = vmatmul.mubr.msk.f32.gmra.mxu0 %vm1565_vm1, %v1540_v48 }
 0x222   : > { %1886 = vmatprep.mubr.f32.mxu0 %v2246_v57 }
 0x2d5   : > { %v1644_v54 = vpop.f32.mrf.mxu0 }
 0x2d6   : > { %v1645_v52 = vadd.f32 %v1644_v54, %v1548_v31 }
 0x2d7   : > { %v1646_v36 = vpop.f32.mrf.mxu0 }
 0x2d8   : > { %v1647_v51 = vadd.f32 %v1646_v36, %v1548_v31 }
 0x2d9   : > { %v1650_v50 = vpop.f32.mrf.mxu0 }
 0x2da   : > { %v1651_v49 = vadd.f32 %v1650_v50, %v1553_v42 }
 0x2db   : > { %v1652_v37 = vpop.f32.mrf.mxu0 }
 0x2dc   : > { %v1653_v46 = vadd.f32 %v1652_v37, %v1553_v42 }
 0x2dd   : > { %v1656_v17 = vpop.f32.mrf.mxu0 }
 0x2de   : > { %v1657_v0 = vadd.f32 %v1656_v17, %v1558_v45 }
 0x2df   : > { %v1658_v29 = vpop.f32.mrf.mxu0 }
 0x2e0   : > { %v1659_v55 = vadd.f32 %v1658_v29, %v1558_v45 }
 0x2e1   : > { %v1662_v30 = vpop.f32.mrf.mxu0 }
 0x2e2   : > { %v1663_v33 = vadd.f32 %v1662_v30, %v1563_v44 }
 0x2e3   : > { %v1664_v28 = vpop.f32.mrf.mxu0 }
 0x2e4   : > { %v1665_v40 = vadd.f32 %v1664_v28, %v1563_v44 }
 0x2e6   : > { %2144 = vtanh.f32 %v1665_v40 }
 0x2e7   : > { %2146 = vtanh.f32 %v1663_v33 }
 0x2e8   : > { %2148 = vtanh.f32 %v1659_v55 }
 0x2e9   : > { %2150 = vtanh.f32 %v1657_v0 }
 0x2ea   : > { %2152 = vtanh.f32 %v1653_v46 }
 0x2eb   : > { %2154 = vtanh.f32 %v1651_v49 }
 0x2ec   : > { %2156 = vtanh.f32 %v1647_v51 }
 0x2ed   : > { %2158 = vtanh.f32 %v1645_v52 }
 0x2f3   : > { %v2145_v53 = vpop.eup %2144 }
 0x2f4   : > { %v2147_v56 = vpop.eup %2146  ;;  %1739 = vmatprep.subr.mxu1 %v2145_v53 }
 0x2f5   : > { %v2149_v58 = vpop.eup %2148  ;;  %1740 = vmatpush1.msra.mxu1 %v2147_v56 }
 0x2f6   : > { %v2151_v38 = vpop.eup %2150  ;;  %1741 = vmatprep.subr.mxu1 %v2149_v58 }
 0x2f7   : > { %v2153_v61 = vpop.eup %2152  ;;  %1742 = vmatpush1.msra.mxu1 %v2151_v38 }
 0x2f8   : > { %v2155_v1 = vpop.eup %2154  ;;  %1743 = vmatprep.subr.mxu1 %v2153_v61 }
 0x2f9   : > { %v2157_v47 = vpop.eup %2156  ;;  %1744 = vmatpush1.msra.mxu1 %v2155_v1 }
 0x2fa   : > { %v2159_v3 = vpop.eup %2158  ;;  %1745 = vmatprep.subr.mxu1 %v2157_v47 }
 0x2fb   : > { %1746 = vmatpush1.msra.mxu1 %v2159_v3 }
 0x2fc   : > { %2030 = vmatmul.mubr.msk.f32.vlgmr.msra.gmra.mxu1 %vm1565_vm1, %v1675_v43 }
 0x2fd   : > { %1785 = vmatprep.mubr.f32.mxu1 %v2246_v57 }
 0x300   : > { %2031 = vmatmul.mubr.msk.f32.gmra.mxu1 %vm1565_vm1, %v1676_v62 }
 0x301   : > { %1791 = vmatprep.mubr.f32.mxu1 %v2246_v57 }
 0x304   : > { %2032 = vmatmul.mubr.msk.f32.gmra.mxu1 %vm1565_vm1, %v1677_v5 }
 0x305   : > { %1797 = vmatprep.mubr.f32.mxu1 %v2246_v57  ;;  %v1691_v57 = vpop.permute.xlu0 %1690 }
 0x308   : > { %2033 = vmatmul.mubr.msk.f32.gmra.mxu1 %vm1565_vm1, %v1678_v21 }
 0x309   : > { %v1817_v35 = vpop.permute.xlu0 %1816 }
 0x3bc   : > { %v1781_v8 = vpop.f32.mrf.mxu1 }
 0x3bd   : > { %v1782_v10 = vadd.f32 %v1781_v8, %v1686_v59 }
 0x3be   : > { %v1783_v6 = vpop.f32.mrf.mxu1 }
 0x3bf   : > { %v1784_v19 = vadd.f32 %v1783_v6, %v1686_v59 }
 0x3c0   : > { %v1787_v9 = vpop.f32.mrf.mxu1 }
 0x3c1   : > { %v1788_v32 = vadd.f32 %v1787_v9, %v1691_v57 }
 0x3c2   : > { %v1789_v41 = vpop.f32.mrf.mxu1 }
 0x3c3   : > { %v1790_v20 = vadd.f32 %v1789_v41, %v1691_v57 }
 0x3c4   : > { %v1793_v4 = vpop.f32.mrf.mxu1 }
 0x3c5   : > { %v1794_v15 = vadd.f32 %v1793_v4, %v1696_v18 }
 0x3c6   : > { %v1795_v7 = vpop.f32.mrf.mxu1 }
 0x3c7   : > { %v1796_v2 = vadd.f32 %v1795_v7, %v1696_v18 }
 0x3c8   : > { %v1799_v12 = vpop.f32.mrf.mxu1 }
 0x3c9   : > { %v1800_v60 = vadd.f32 %v1799_v12, %v1701_v11 }
 0x3ca   : > { %v1801_v63 = vpop.f32.mrf.mxu1 }
 0x3cb   : > { %v1802_v14 = vadd.f32 %v1801_v63, %v1701_v11 }
 0x3cd   : > { %2160 = vtanh.f32 %v1802_v14 }
 0x3ce   : > { %2162 = vtanh.f32 %v1800_v60 }
 0x3cf   : > { %2164 = vtanh.f32 %v1796_v2 }
 0x3d0   : > { %2166 = vtanh.f32 %v1794_v15 }
 0x3d1   : > { %2168 = vtanh.f32 %v1790_v20 }
 0x3d2   : > { %2170 = vtanh.f32 %v1788_v32 }
 0x3d3   : > { %2172 = vtanh.f32 %v1784_v19 }
 0x3d4   : > { %2174 = vtanh.f32 %v1782_v10 }
 0x3da   : > { %v2161_v16 = vpop.eup %2160 }
 0x3db   : > { %v2163_v34 = vpop.eup %2162  ;;  %1846 = vmatprep.subr.mxu0 %v2161_v16 }
 0x3dc   : > { %v2165_v22 = vpop.eup %2164  ;;  %1847 = vmatpush1.msra.mxu0 %v2163_v34 }
 0x3dd   : > { %v2167_v24 = vpop.eup %2166  ;;  %1848 = vmatprep.subr.mxu0 %v2165_v22 }
 0x3de   : > { %v2169_v26 = vpop.eup %2168  ;;  %1849 = vmatpush1.msra.mxu0 %v2167_v24 }
 0x3df   : > { %v2171_v13 = vpop.eup %2170  ;;  %1850 = vmatprep.subr.mxu0 %v2169_v26 }
 0x3e0   : > { %v2173_v25 = vpop.eup %2172  ;;  %1851 = vmatpush1.msra.mxu0 %v2171_v13 }
 0x3e1   : > { %v2175_v27 = vpop.eup %2174  ;;  %1852 = vmatprep.subr.mxu0 %v2173_v25 }
 0x3e2   : > { %1853 = vmatpush1.msra.mxu0 %v2175_v27 }
 0x3e3   : > { %2034 = vmatmul.mubr.msk.f32.vlgmr.msra.gmra.mxu0 %vm1565_vm1, %v1812_v23 }
 0x4a3   : > { %v1888_v39 = vpop.f32.mrf.mxu0 }
 0x4a4   : > { %v1889_v54 = vadd.f32 %v1888_v39, %v1817_v35 }
 0x4a5   : > { %v1890_v48 = vpop.f32.mrf.mxu0 }
 0x4a6   : > { %v1891_v36 = vadd.f32 %v1890_v48, %v1817_v35 }
 0x4a8   : > { %v1895_v50 = vcombine.low %v1889_v54, %v1891_v36 }
 0x4aa   : > { %2035 = vst.sshfl [vmem:[%s380_s12] sm:$0x33 pattern:$0x76325410] %v1895_v50 }
 0x4ab   : > { %2189 = shalt.err (!%p2186_p3)
}
 0x4ac   : > { %s2190_s29 = scalar_lea.hbm %s1918_s16, 64  ;;  %s2194_s12 = scalar_lea.hbm %s2861_s11, 512 }
 0x4ad   : > { %p2191_p4 = scmp.ne.s32.totalorder %s1918_s16, %s2190_s29  ;;  %p2195_p9 = scmp.lt.s32.totalorder %s1918_s16, %s2861_s11 }
 0x4ae   : > { %p2196_p10 = scmp.lt.s32.totalorder %s2194_s12, %s2190_s29 }
 0x4af   : > { %p2192_p7 = pnand %p2191_p4, %p2346_p5 }
 0x4b0   : > { %p2197_p11 = por %p2196_p10, %p2195_p9 }
 0x4b1   : > { %p2193_p8 = pneg %p2192_p7 }
 0x4b3   : > { %p2198_p12 = pnand %p2197_p11, %p2193_p8 }
 0x4b5   : > { %2201 = shalt.err (!%p2198_p12)
}
 0x4b6   : > { %2058 = dma.vmem_to_hbm [thread:$0]  (%p2346_p5), %s1921_s13, 64, %s1918_s16, %s1906_s22  }
 0x4b7 PF: > { %p2064_p13 = scmp.ge.s32.totalorder %s2236_s20, 2  ;;  %s1932_s0 = sand.u32 1, %s2224_s17  }
 0x4b8   : > { %s1933_s1 = scalar_lea.sflag [#allocation3], %s1932_s0 }
 0x4b9   : > { %p2061_p0 = pnand %p2064_p13, %p2350_p6 }
 0x4bb   : > { %p2062_p1 = pneg %p2061_p0 }
 0x4bd   : > { %2219 = dma.done.wait (%p2062_p1), %s1933_s1, 64  }
 0x4be   : > { %2221 = vsyncadd (%p2062_p1), %s1933_s1, 4294967232  ;;  %p21_p2 = scmp.ge.s32.totalorder %s2333_s23, 10   ;;  %s2872_s17 = smov %s2228_s18 }
 0x4bf   : > { %s2873_s18 = smov %s2232_s19  ;;  %s2874_s19 = smov %s2344_s26 }
 0x4c0   : > { %s2875_s20 = smov %s2333_s23  ;;  %23 = sbr.rel (!%p21_p2) target bundleno = 6 (0x6), region = 99 }
 0x4c5   :  { %1938 = vsyncpa [#allocation3], 1 }
 0x4c6   :  { %1940 = vsyncpa [#allocation3 + $0x1], 1 }

</bundles_post_ra>
